<compile_context>
chip_gen: v7x
topology: tpu7x:2x2x1
jax: 0.10.0
libtpu: 0.0.40
codegen_flags: <defaults>
</compile_context>

<pallas_src>
import math
import functools

import jax
import jax.numpy as jnp
from jax.experimental import pallas as pl
from jax.experimental.pallas import tpu as pltpu


# --------------------------------------------------------------------------
# helpers
# --------------------------------------------------------------------------
def _round_up(x, m):
    return (x + m - 1) // m * m


def _pick_tile(dim, candidates):
    """Largest candidate tile that divides `dim` (falls back to full dim)."""
    for t in candidates:
        if t <= dim and dim % t == 0:
            return t
    return dim


_VMEM_LIMIT = 32 * 1024 * 1024   # safe scoped-VMEM budget on v5e/v6e/v7x


# --------------------------------------------------------------------------
# Kernel 1: y = x @ w + b   (bf16 MXU, f32 accumulate, full-K contraction)
# --------------------------------------------------------------------------
def _matmul_bias_kernel(x_ref, w_ref, b_ref, o_ref):
    acc = jnp.dot(x_ref[...], w_ref[...], preferred_element_type=jnp.float32)
    o_ref[...] = (acc + b_ref[...]).astype(o_ref.dtype)


def linear_pallas(x, w, b=None, *, out_dtype=None, tm_pref=256, tn_pref=256):
    """x: (M, K) @ w: (K, N) + b: (N,).  K contracted in a single MXU pass.

    Fine for ViT-sized K (<= ~2K).
    # TODO(synk): add a K-reduction grid axis for very large K.
    """
    m, kd = x.shape
    kd2, n = w.shape
    assert kd == kd2
    out_dtype = out_dtype or x.dtype

    if b is None:
        b = jnp.zeros((1, n), dtype=jnp.float32)
    else:
        b = b.reshape(1, n).astype(jnp.float32)

    x = x.astype(jnp.bfloat16)
    w = w.astype(jnp.bfloat16)

    # token-axis tile: keep >=2 blocks whenever possible (v7x has 2 TCs)
    if m >= 2 * tm_pref:
        tm = tm_pref
    elif m >= 2 * 128:
        tm = 128
    else:
        tm = _round_up(m, 8)
    tn = _pick_tile(n, (tn_pref, 128))

    m_pad = _round_up(m, tm)
    if m_pad != m:
        x = jnp.pad(x, ((0, m_pad - m), (0, 0)))

    gm, gn = m_pad // tm, n // tn
    out_bytes = jnp.dtype(out_dtype).itemsize
    cost = pl.CostEstimate(
        flops=2 * m_pad * kd * n,
        transcendentals=0,
        bytes_accessed=int(2 * m_pad * kd * gn        # x re-read per N tile
                           + 2 * kd * n * gm          # w re-read per M tile
                           + 4 * n * gm               # bias
                           + out_bytes * m_pad * n),  # output write
    )

    out = pl.pallas_call(
        _matmul_bias_kernel,
        out_shape=jax.ShapeDtypeStruct((m_pad, n), out_dtype),
        grid_spec=pltpu.PrefetchScalarGridSpec(
            num_scalar_prefetch=0,
            grid=(gm, gn),
            in_specs=[
                pl.BlockSpec((tm, kd), lambda i, j: (i, 0)),   # x tile (full K)
                pl.BlockSpec((kd, tn), lambda i, j: (0, j)),   # w slab (full K)
                pl.BlockSpec((1, tn), lambda i, j: (0, j)),    # bias
            ],
            out_specs=pl.BlockSpec((tm, tn), lambda i, j: (i, j)),
        ),
        compiler_params=pltpu.CompilerParams(
            dimension_semantics=("parallel", "parallel"),
            vmem_limit_bytes=_VMEM_LIMIT),
        cost_estimate=cost,
    )(x, w, b)
    return out[:m]


# --------------------------------------------------------------------------
# Kernel 2: flash-style attention, reading head slices straight from the
#           fused qkv tensor (B, N, 3*H*hd); grid = (B, H, Nq, Nkv)
# --------------------------------------------------------------------------
def _flash_attn_kernel(q_ref, k_ref, v_ref, o_ref,
                       q_sc, m_scr, l_scr, acc_scr, *, scale, kv_len, tkv):
    ki = pl.program_id(3)

    @pl.when(ki == 0)
    def _init():
        # q block is resident across the kv axis: scale+cast it once.
        q_sc[...] = (q_ref[...].astype(jnp.float32) * scale).astype(jnp.bfloat16)
        m_scr[...] = jnp.full(m_scr.shape, -1e30, jnp.float32)
        l_scr[...] = jnp.zeros(l_scr.shape, jnp.float32)
        acc_scr[...] = jnp.zeros(acc_scr.shape, jnp.float32)

    # s = (q*scale) @ k^T : bf16 on the MXU, f32 accumulation   -> (tq, tkv)
    s = jax.lax.dot_general(
        q_sc[...], k_ref[...],
        dimension_numbers=(((1,), (1,)), ((), ())),
        preferred_element_type=jnp.float32)

    if kv_len is not None:  # static: only emitted when the kv axis was padded
        kv_pos = ki * tkv + jax.lax.broadcasted_iota(jnp.int32, s.shape, 1)
        s = jnp.where(kv_pos < kv_len, s, -1e30)

    # online softmax (f32 — v5e has no bf16 VPU/EUP)
    m_prev = m_scr[...]
    m_new = jnp.maximum(m_prev, s.max(axis=-1, keepdims=True))
    alpha = jnp.exp(m_prev - m_new)
    p = jnp.exp(s - m_new)

    l_scr[...] = alpha * l_scr[...] + p.sum(axis=-1, keepdims=True)
    acc_scr[...] = alpha * acc_scr[...] + jnp.dot(
        p.astype(jnp.bfloat16), v_ref[...], preferred_element_type=jnp.float32)
    m_scr[...] = m_new

    @pl.when(ki == pl.num_programs(3) - 1)
    def _finalize():
        inv_l = pl.reciprocal(l_scr[...], approx=True)   # EUP slot, ~free
        o_ref[...] = (acc_scr[...] * inv_l).astype(o_ref.dtype)


def multihead_attention_pallas(qkv, num_heads, head_dim, scale, *,
                               tq_pref=256, tkv_pref=512,
                               out_dtype=jnp.bfloat16):
    """qkv: (B, N, 3*num_heads*head_dim) laid out [q_heads | k_heads | v_heads]
    (exactly the fused QKV-projection output).  Returns (B, N, num_heads*head_dim)."""
    B, N, three_d = qkv.shape
    D = num_heads * head_dim
    assert three_d == 3 * D
    H = num_heads

    qkv = qkv.astype(jnp.bfloat16)

    # Lane-dense head slices need head_dim % 128 == 0; otherwise zero-pad the
    # head dim (exact: padded q/k columns contribute 0 to scores, padded v
    # columns are sliced off).
    hd = _round_up(head_dim, 128)
    if hd != head_dim:
        qkv = qkv.reshape(B, N, 3 * H, head_dim)
        qkv = jnp.pad(qkv, ((0, 0), (0, 0), (0, 0), (0, hd - head_dim)))
        qkv = qkv.reshape(B, N, 3 * H * hd)

    # Pad the sequence axis to a multiple of 128 (no full-dim tile fallback);
    # padded kv positions are masked inside the kernel.
    n_pad = _round_up(N, 128)
    kv_len = None
    if n_pad != N:
        qkv = jnp.pad(qkv, ((0, 0), (0, n_pad - N), (0, 0)))
        kv_len = N

    tq = _pick_tile(n_pad, (tq_pref, 128))
    tkv = _pick_tile(n_pad, (tkv_pref, 256, 128))
    gq, gkv = n_pad // tq, n_pad // tkv

    kernel = functools.partial(_flash_attn_kernel, scale=float(scale),
                               kv_len=kv_len, tkv=tkv)

    out_bytes = jnp.dtype(out_dtype).itemsize
    cost = pl.CostEstimate(
        flops=4 * B * H * n_pad * n_pad * hd,
        transcendentals=B * H * n_pad * n_pad,
        bytes_accessed=int(2 * B * H * n_pad * hd * (1 + 2 * gq)  # q once, k/v per q-tile
                           + out_bytes * B * n_pad * H * hd),
    )

    out = pl.pallas_call(
        kernel,
        out_shape=jax.ShapeDtypeStruct((B, n_pad, H * hd), out_dtype),
        grid_spec=pltpu.PrefetchScalarGridSpec(
            num_scalar_prefetch=0,
            grid=(B, H, gq, gkv),
            in_specs=[
                # q / k / v head slices straight from the fused qkv (no transposes)
                pl.BlockSpec((None, tq, hd),
                             lambda b, h, qi, ki: (b, qi, h)),
                pl.BlockSpec((None, tkv, hd),
                             lambda b, h, qi, ki: (b, ki, H + h)),
                pl.BlockSpec((None, tkv, hd),
                             lambda b, h, qi, ki: (b, ki, 2 * H + h)),
            ],
            out_specs=pl.BlockSpec((None, tq, hd),
                                   lambda b, h, qi, ki: (b, qi, h)),
            scratch_shapes=[
                pltpu.VMEM((tq, hd), jnp.bfloat16),   # scaled q (reused over kv)
                pltpu.VMEM((tq, 1), jnp.float32),     # running max
                pltpu.VMEM((tq, 1), jnp.float32),     # running denom
                pltpu.VMEM((tq, hd), jnp.float32),    # output accumulator
            ],
        ),
        compiler_params=pltpu.CompilerParams(
            dimension_semantics=("parallel", "parallel", "parallel", "arbitrary"),
            vmem_limit_bytes=_VMEM_LIMIT),
        cost_estimate=cost,
    )(qkv, qkv, qkv)

    out = out[:, :N]
    if hd != head_dim:
        out = out.reshape(B, N, H, hd)[..., :head_dim].reshape(B, N, D)
    return out


# --------------------------------------------------------------------------
# Full Attention.forward
# --------------------------------------------------------------------------
def attention_pallas(x, w_qkv, q_bias, v_bias, w_proj, b_proj, *, num_heads,
                     qk_scale=None):
    B, N, C = x.shape
    all_head_dim = w_qkv.shape[1] // 3
    head_dim = all_head_dim // num_heads
    scale = float(qk_scale) if qk_scale is not None else float(head_dim) ** -0.5

    if q_bias is not None:
        qkv_bias = jnp.concatenate(
            [q_bias, jnp.zeros_like(v_bias), v_bias])          # (3*D,), zero k bias
    else:
        qkv_bias = None

    # --- fused QKV projection (bf16 MXU, f32 accumulate) ---------------------
    x2d = x.reshape(B * N, C)
    qkv = linear_pallas(x2d, w_qkv, qkv_bias, out_dtype=jnp.bfloat16)  # (B*N, 3D)
    qkv = qkv.reshape(B, N, 3 * all_head_dim)        # free reshape, no transpose

    # --- flash attention on the fused layout (attn_drop p=0 -> identity) -----
    attn_out = multihead_attention_pallas(qkv, num_heads, head_dim, scale)
    attn_out = attn_out.reshape(B * N, all_head_dim)  # free reshape

    # --- output projection (proj_drop p=0 -> identity) ------------------------
    out2d = linear_pallas(attn_out, w_proj, b_proj, out_dtype=x.dtype)
    return out2d.reshape(B, N, C)


# --------------------------------------------------------------------------
# Pure-JAX f32 reference (mirrors the PyTorch forward exactly)
# --------------------------------------------------------------------------
def reference_attention(x, w_qkv, qkv_bias, w_proj, b_proj, num_heads, scale):
    B, N, C = x.shape
    all_head_dim = w_qkv.shape[1] // 3
    hd = all_head_dim // num_heads

    qkv = x.reshape(B * N, C) @ w_qkv
    if qkv_bias is not None:
        qkv = qkv + qkv_bias
    qkv = qkv.reshape(B, N, 3, num_heads, hd)
    qkv = jnp.transpose(qkv, (2, 0, 3, 1, 4))
    q, k, v = qkv[0], qkv[1], qkv[2]
    q = q * scale
    attn = jnp.einsum("bhqd,bhkd->bhqk", q, k)
    attn = jax.nn.softmax(attn, axis=-1)
    out = jnp.einsum("bhqk,bhkd->bhqd", attn, v)
    out = jnp.transpose(out, (0, 2, 1, 3)).reshape(B * N, all_head_dim)
    out = out @ w_proj + b_proj
    return out.reshape(B, N, C)


# --------------------------------------------------------------------------
if __name__ == "__main__":
    # Small, lane-dense shapes: seq=128, dim=256, 2 heads -> head_dim=128,
    # so every last dim is a multiple of 128 and every grid has >=2 parallel blocks.
    B, N, C, H = 2, 128, 256, 2
    head_dim = C // H
    all_head_dim = head_dim * H
    scale = head_dim ** (-0.5)

    key = jax.random.PRNGKey(0)
    kx, kw1, kqb, kvb, kw2, kb2 = jax.random.split(key, 6)

    x = jax.random.normal(kx, (B, N, C), dtype=jnp.float32)

    lim1 = 1.0 / math.sqrt(C)
    lim2 = 1.0 / math.sqrt(all_head_dim)
    w_qkv = jax.random.uniform(kw1, (C, 3 * all_head_dim), jnp.float32, -lim1, lim1)
    q_bias = jax.random.uniform(kqb, (all_head_dim,), jnp.float32, -lim1, lim1)
    v_bias = jax.random.uniform(kvb, (all_head_dim,), jnp.float32, -lim1, lim1)
    w_proj = jax.random.uniform(kw2, (all_head_dim, C), jnp.float32, -lim2, lim2)
    b_proj = jax.random.uniform(kb2, (C,), jnp.float32, -lim2, lim2)

    attn_fn = jax.jit(functools.partial(attention_pallas, num_heads=H))
    out = attn_fn(x, w_qkv, q_bias, v_bias, w_proj, b_proj)
    out = jax.block_until_ready(out)

    qkv_bias_vec = jnp.concatenate([q_bias, jnp.zeros_like(v_bias), v_bias])
    ref = reference_attention(x, w_qkv, qkv_bias_vec, w_proj, b_proj, H, scale)

    assert out.shape == (B, N, C)
    # bf16 MXU inputs with f32 accumulation -> looser tolerance vs f32 reference
    assert jnp.allclose(out, ref, atol=2e-2, rtol=2e-2), "mismatch vs reference"

    print("KERNEL_OK")
</pallas_src>

<mosaic_0001>
module attributes {stable_mosaic.version = 11 : i64} {
  func.func @_matmul_bias_kernel(%arg0: i32, %arg1: i32, %arg2: memref<128x256xbf16, #tpu.memory_space<vmem>>, %arg3: memref<256x256xbf16, #tpu.memory_space<vmem>>, %arg4: memref<1x256xf32, #tpu.memory_space<vmem>>, %arg5: memref<128x256xbf16, #tpu.memory_space<vmem>>) attributes {dimension_semantics = [#tpu.dimension_semantics<parallel>, #tpu.dimension_semantics<parallel>], iteration_bounds = array<i64: 2, 3>, scalar_prefetch = 0 : i64, scratch_operands = 0 : i64, tpu.core_type = #tpu.core_type<tc>, window_params = [{transform_indices = @transform_0, window_bounds = array<i64: 128, 256>}, {transform_indices = @transform_1, window_bounds = array<i64: 256, 256>}, {transform_indices = @transform_2, window_bounds = array<i64: 1, 256>}, {transform_indices = @transform_3, window_bounds = array<i64: 128, 256>}]} {
    %c0 = arith.constant 0 : index
    %c0_0 = arith.constant 0 : index
    %0 = vector.load %arg2[%c0, %c0_0] : memref<128x256xbf16, #tpu.memory_space<vmem>>, vector<128x256xbf16>
    %c0_1 = arith.constant 0 : index
    %c0_2 = arith.constant 0 : index
    %1 = vector.load %arg3[%c0_1, %c0_2] : memref<256x256xbf16, #tpu.memory_space<vmem>>, vector<256x256xbf16>
    %cst = arith.constant dense<0.000000e+00> : vector<128x256xf32>
    %2 = tpu.matmul %0, %1, %cst {dimension_numbers = #tpu.dot_dimension_numbers<[1], [0], [0], [1], [0, 0, 1, 1], [], []>} : vector<128x256xbf16>, vector<256x256xbf16>, vector<128x256xf32> -> vector<128x256xf32>
    %c0_3 = arith.constant 0 : index
    %c0_4 = arith.constant 0 : index
    %3 = vector.load %arg4[%c0_3, %c0_4] : memref<1x256xf32, #tpu.memory_space<vmem>>, vector<1x256xf32>
    %4 = vector.broadcast %3 : vector<1x256xf32> to vector<128x256xf32>
    %5 = arith.addf %2, %4 : vector<128x256xf32>
    %6 = arith.truncf %5 : vector<128x256xf32> to vector<128x256xbf16>
    %c0_5 = arith.constant 0 : index
    %c0_6 = arith.constant 0 : index
    %7 = vector.load %arg5[%c0_5, %c0_6] : memref<128x256xbf16, #tpu.memory_space<vmem>>, vector<128x256xbf16>
    tpu.vector_store %arg5[%c0_5, %c0_6], %6 {strides = array<i32>} : memref<128x256xbf16, #tpu.memory_space<vmem>>, vector<128x256xbf16>,
    return
  }
  func.func @transform_0(%arg0: i32, %arg1: i32) -> (i32, i32) {
    %c0_i32 = arith.constant 0 : i32
    %c0_i32_0 = arith.constant 0 : i32
    return %arg0, %c0_i32 : i32, i32
  }
  func.func @transform_1(%arg0: i32, %arg1: i32) -> (i32, i32) {
    %c0_i32 = arith.constant 0 : i32
    %c0_i32_0 = arith.constant 0 : i32
    return %c0_i32, %arg1 : i32, i32
  }
  func.func @transform_2(%arg0: i32, %arg1: i32) -> (i32, i32) {
    %c0_i32 = arith.constant 0 : i32
    %c0_i32_0 = arith.constant 0 : i32
    return %c0_i32, %arg1 : i32, i32
  }
  func.func @transform_3(%arg0: i32, %arg1: i32) -> (i32, i32) {
    %c0_i32 = arith.constant 0 : i32
    return %arg0, %arg1 : i32, i32
  }
}

module attributes {stable_mosaic.version = 11 : i64} {
  func.func @_matmul_bias_kernel(%arg0: i32, %arg1: i32, %arg2: memref<128x256xbf16, #tpu.memory_space<vmem>>, %arg3: memref<256x256xbf16, #tpu.memory_space<vmem>>, %arg4: memref<1x256xf32, #tpu.memory_space<vmem>>, %arg5: memref<128x256xf32, #tpu.memory_space<vmem>>) attributes {dimension_semantics = [#tpu.dimension_semantics<parallel>, #tpu.dimension_semantics<parallel>], iteration_bounds = array<i64: 2, 1>, scalar_prefetch = 0 : i64, scratch_operands = 0 : i64, tpu.core_type = #tpu.core_type<tc>, window_params = [{transform_indices = @transform_0, window_bounds = array<i64: 128, 256>}, {transform_indices = @transform_1, window_bounds = array<i64: 256, 256>}, {transform_indices = @transform_2, window_bounds = array<i64: 1, 256>}, {transform_indices = @transform_3, window_bounds = array<i64: 128, 256>}]} {
    %c0 = arith.constant 0 : index
    %c0_0 = arith.constant 0 : index
    %0 = vector.load %arg2[%c0, %c0_0] : memref<128x256xbf16, #tpu.memory_space<vmem>>, vector<128x256xbf16>
    %c0_1 = arith.constant 0 : index
    %c0_2 = arith.constant 0 : index
    %1 = vector.load %arg3[%c0_1, %c0_2] : memref<256x256xbf16, #tpu.memory_space<vmem>>, vector<256x256xbf16>
    %cst = arith.constant dense<0.000000e+00> : vector<128x256xf32>
    %2 = tpu.matmul %0, %1, %cst {dimension_numbers = #tpu.dot_dimension_numbers<[1], [0], [0], [1], [0, 0, 1, 1], [], []>} : vector<128x256xbf16>, vector<256x256xbf16>, vector<128x256xf32> -> vector<128x256xf32>
    %c0_3 = arith.constant 0 : index
    %c0_4 = arith.constant 0 : index
    %3 = vector.load %arg4[%c0_3, %c0_4] : memref<1x256xf32, #tpu.memory_space<vmem>>, vector<1x256xf32>
    %4 = vector.broadcast %3 : vector<1x256xf32> to vector<128x256xf32>
    %5 = arith.addf %2, %4 : vector<128x256xf32>
    %c0_5 = arith.constant 0 : index
    %c0_6 = arith.constant 0 : index
    %6 = vector.load %arg5[%c0_5, %c0_6] : memref<128x256xf32, #tpu.memory_space<vmem>>, vector<128x256xf32>
    tpu.vector_store %arg5[%c0_5, %c0_6], %5 {strides = array<i32>} : memref<128x256xf32, #tpu.memory_space<vmem>>, vector<128x256xf32>,
    return
  }
  func.func @transform_0(%arg0: i32, %arg1: i32) -> (i32, i32) {
    %c0_i32 = arith.constant 0 : i32
    %c0_i32_0 = arith.constant 0 : i32
    return %arg0, %c0_i32 : i32, i32
  }
  func.func @transform_1(%arg0: i32, %arg1: i32) -> (i32, i32) {
    %c0_i32 = arith.constant 0 : i32
    %c0_i32_0 = arith.constant 0 : i32
    return %c0_i32, %arg1 : i32, i32
  }
  func.func @transform_2(%arg0: i32, %arg1: i32) -> (i32, i32) {
    %c0_i32 = arith.constant 0 : i32
    %c0_i32_0 = arith.constant 0 : i32
    return %c0_i32, %arg1 : i32, i32
  }
  func.func @transform_3(%arg0: i32, %arg1: i32) -> (i32, i32) {
    %c0_i32 = arith.constant 0 : i32
    return %arg0, %arg1 : i32, i32
  }
}

module attributes {stable_mosaic.version = 11 : i64} {
  func.func @_flash_attn_kernel(%arg0: i32, %arg1: i32, %arg2: i32, %arg3: i32, %arg4: memref<1x128x128xbf16, #tpu.memory_space<vmem>>, %arg5: memref<1x128x128xbf16, #tpu.memory_space<vmem>>, %arg6: memref<1x128x128xbf16, #tpu.memory_space<vmem>>, %arg7: memref<1x128x128xbf16, #tpu.memory_space<vmem>>, %arg8: memref<128x128xbf16, #tpu.memory_space<vmem>>, %arg9: memref<128x1xf32, #tpu.memory_space<vmem>>, %arg10: memref<128x1xf32, #tpu.memory_space<vmem>>, %arg11: memref<128x128xf32, #tpu.memory_space<vmem>>) attributes {dimension_semantics = [#tpu.dimension_semantics<parallel>, #tpu.dimension_semantics<parallel>, #tpu.dimension_semantics<parallel>, #tpu.dimension_semantics<arbitrary>], iteration_bounds = array<i64: 2, 2, 1, 1>, scalar_prefetch = 0 : i64, scratch_operands = 4 : i64, tpu.core_type = #tpu.core_type<tc>, window_params = [{transform_indices = @transform_0, window_bounds = array<i64: 1, 128, 128>}, {transform_indices = @transform_1, window_bounds = array<i64: 1, 128, 128>}, {transform_indices = @transform_2, window_bounds = array<i64: 1, 128, 128>}, {transform_indices = @transform_3, window_bounds = array<i64: 1, 128, 128>}]} {
    %c0_i32 = arith.constant 0 : i32
    %0 = arith.cmpi eq, %arg3, %c0_i32 : i32
    %1 = arith.extui %0 : i1 to i32
    %c0_i32_0 = arith.constant 0 : i32
    %2 = arith.cmpi ne, %1, %c0_i32_0 : i32
    scf.if %2 {
      %c0_25 = arith.constant 0 : index
      %c0_26 = arith.constant 0 : index
      %c0_27 = arith.constant 0 : index
      %35 = vector.load %arg4[%c0_25, %c0_26, %c0_27] : memref<1x128x128xbf16, #tpu.memory_space<vmem>>, vector<1x128x128xbf16>
      %36 = vector.shape_cast %35 : vector<1x128x128xbf16> to vector<128x128xbf16>
      %37 = arith.extf %36 : vector<128x128xbf16> to vector<128x128xf32>
      %cst_28 = arith.constant 0.0883883461 : f32
      %38 = vector.broadcast %cst_28 : f32 to vector<128x128xf32>
      %39 = arith.mulf %37, %38 : vector<128x128xf32>
      %40 = arith.truncf %39 : vector<128x128xf32> to vector<128x128xbf16>
      %c0_29 = arith.constant 0 : index
      %c0_30 = arith.constant 0 : index
      %41 = vector.load %arg8[%c0_29, %c0_30] : memref<128x128xbf16, #tpu.memory_space<vmem>>, vector<128x128xbf16>
      tpu.vector_store %arg8[%c0_29, %c0_30], %40 {strides = array<i32>} : memref<128x128xbf16, #tpu.memory_space<vmem>>, vector<128x128xbf16>,
      %cst_31 = arith.constant -1.000000e+30 : f32
      %42 = vector.broadcast %cst_31 : f32 to vector<128x1xf32>
      %c0_32 = arith.constant 0 : index
      %c0_33 = arith.constant 0 : index
      %43 = vector.load %arg9[%c0_32, %c0_33] : memref<128x1xf32, #tpu.memory_space<vmem>>, vector<128x1xf32>
      tpu.vector_store %arg9[%c0_32, %c0_33], %42 {strides = array<i32>} : memref<128x1xf32, #tpu.memory_space<vmem>>, vector<128x1xf32>,
      %cst_34 = arith.constant 0.000000e+00 : f32
      %44 = vector.broadcast %cst_34 : f32 to vector<128x1xf32>
      %c0_35 = arith.constant 0 : index
      %c0_36 = arith.constant 0 : index
      %45 = vector.load %arg10[%c0_35, %c0_36] : memref<128x1xf32, #tpu.memory_space<vmem>>, vector<128x1xf32>
      tpu.vector_store %arg10[%c0_35, %c0_36], %44 {strides = array<i32>} : memref<128x1xf32, #tpu.memory_space<vmem>>, vector<128x1xf32>,
      %cst_37 = arith.constant 0.000000e+00 : f32
      %46 = vector.broadcast %cst_37 : f32 to vector<128x128xf32>
      %c0_38 = arith.constant 0 : index
      %c0_39 = arith.constant 0 : index
      %47 = vector.load %arg11[%c0_38, %c0_39] : memref<128x128xf32, #tpu.memory_space<vmem>>, vector<128x128xf32>
      tpu.vector_store %arg11[%c0_38, %c0_39], %46 {strides = array<i32>} : memref<128x128xf32, #tpu.memory_space<vmem>>, vector<128x128xf32>,
    } else {
    }
    %c0 = arith.constant 0 : index
    %c0_1 = arith.constant 0 : index
    %3 = vector.load %arg8[%c0, %c0_1] : memref<128x128xbf16, #tpu.memory_space<vmem>>, vector<128x128xbf16>
    %c0_2 = arith.constant 0 : index
    %c0_3 = arith.constant 0 : index
    %c0_4 = arith.constant 0 : index
    %4 = vector.load %arg5[%c0_2, %c0_3, %c0_4] : memref<1x128x128xbf16, #tpu.memory_space<vmem>>, vector<1x128x128xbf16>
    %5 = vector.shape_cast %4 : vector<1x128x128xbf16> to vector<128x128xbf16>
    %cst = arith.constant dense<0.000000e+00> : vector<128x128xf32>
    %6 = tpu.matmul %3, %5, %cst {dimension_numbers = #tpu.dot_dimension_numbers<[1], [1], [0], [0], [0, 0, 1, 0], [], []>} : vector<128x128xbf16>, vector<128x128xbf16>, vector<128x128xf32> -> vector<128x128xf32>
    %c0_5 = arith.constant 0 : index
    %c0_6 = arith.constant 0 : index
    %7 = vector.load %arg9[%c0_5, %c0_6] : memref<128x1xf32, #tpu.memory_space<vmem>>, vector<128x1xf32>
    %cst_7 = arith.constant dense<0xFF800000> : vector<128xf32>
    %8 = vector.multi_reduction <maximumf>, %6, %cst_7 [1] : vector<128x128xf32> to vector<128xf32>
    %9 = vector.shape_cast %8 : vector<128xf32> to vector<128x1xf32>
    %10 = arith.maximumf %7, %9 : vector<128x1xf32>
    %11 = arith.subf %7, %10 : vector<128x1xf32>
    %12 = math.exp %11 : vector<128x1xf32>
    %13 = vector.broadcast %10 : vector<128x1xf32> to vector<128x128xf32>
    %14 = arith.subf %6, %13 : vector<128x128xf32>
    %15 = math.exp %14 : vector<128x128xf32>
    %c0_8 = arith.constant 0 : index
    %c0_9 = arith.constant 0 : index
    %16 = vector.load %arg10[%c0_8, %c0_9] : memref<128x1xf32, #tpu.memory_space<vmem>>, vector<128x1xf32>
    %17 = arith.mulf %12, %16 : vector<128x1xf32>
    %cst_10 = arith.constant dense<0.000000e+00> : vector<128xf32>
    %18 = vector.multi_reduction <add>, %15, %cst_10 [1] : vector<128x128xf32> to vector<128xf32>
    %19 = vector.shape_cast %18 : vector<128xf32> to vector<128x1xf32>
    %20 = arith.addf %17, %19 : vector<128x1xf32>
    %c0_11 = arith.constant 0 : index
    %c0_12 = arith.constant 0 : index
    %21 = vector.load %arg10[%c0_11, %c0_12] : memref<128x1xf32, #tpu.memory_space<vmem>>, vector<128x1xf32>
    tpu.vector_store %arg10[%c0_11, %c0_12], %20 {strides = array<i32>} : memref<128x1xf32, #tpu.memory_space<vmem>>, vector<128x1xf32>,
    %c0_13 = arith.constant 0 : index
    %c0_14 = arith.constant 0 : index
    %22 = vector.load %arg11[%c0_13, %c0_14] : memref<128x128xf32, #tpu.memory_space<vmem>>, vector<128x128xf32>
    %23 = vector.broadcast %12 : vector<128x1xf32> to vector<128x128xf32>
    %24 = arith.mulf %23, %22 : vector<128x128xf32>
    %25 = arith.truncf %15 : vector<128x128xf32> to vector<128x128xbf16>
    %c0_15 = arith.constant 0 : index
    %c0_16 = arith.constant 0 : index
    %c0_17 = arith.constant 0 : index
    %26 = vector.load %arg6[%c0_15, %c0_16, %c0_17] : memref<1x128x128xbf16, #tpu.memory_space<vmem>>, vector<1x128x128xbf16>
    %27 = vector.shape_cast %26 : vector<1x128x128xbf16> to vector<128x128xbf16>
    %cst_18 = arith.constant dense<0.000000e+00> : vector<128x128xf32>
    %28 = tpu.matmul %25, %27, %cst_18 {dimension_numbers = #tpu.dot_dimension_numbers<[1], [0], [0], [1], [0, 0, 1, 1], [], []>} : vector<128x128xbf16>, vector<128x128xbf16>, vector<128x128xf32> -> vector<128x128xf32>
    %29 = arith.addf %24, %28 : vector<128x128xf32>
    %c0_19 = arith.constant 0 : index
    %c0_20 = arith.constant 0 : index
    %30 = vector.load %arg11[%c0_19, %c0_20] : memref<128x128xf32, #tpu.memory_space<vmem>>, vector<128x128xf32>
    tpu.vector_store %arg11[%c0_19, %c0_20], %29 {strides = array<i32>} : memref<128x128xf32, #tpu.memory_space<vmem>>, vector<128x128xf32>,
    %c0_21 = arith.constant 0 : index
    %c0_22 = arith.constant 0 : index
    %31 = vector.load %arg9[%c0_21, %c0_22] : memref<128x1xf32, #tpu.memory_space<vmem>>, vector<128x1xf32>
    tpu.vector_store %arg9[%c0_21, %c0_22], %10 {strides = array<i32>} : memref<128x1xf32, #tpu.memory_space<vmem>>, vector<128x1xf32>,
    %c0_i32_23 = arith.constant 0 : i32
    %32 = arith.cmpi eq, %arg3, %c0_i32_23 : i32
    %33 = arith.extui %32 : i1 to i32
    %c0_i32_24 = arith.constant 0 : i32
    %34 = arith.cmpi ne, %33, %c0_i32_24 : i32
    scf.if %34 {
      %c0_25 = arith.constant 0 : index
      %c0_26 = arith.constant 0 : index
      %35 = vector.load %arg10[%c0_25, %c0_26] : memref<128x1xf32, #tpu.memory_space<vmem>>, vector<128x1xf32>
      %36 = tpu.reciprocal %35 {approx = true} : vector<128x1xf32> -> vector<128x1xf32>
      %c0_27 = arith.constant 0 : index
      %c0_28 = arith.constant 0 : index
      %37 = vector.load %arg11[%c0_27, %c0_28] : memref<128x128xf32, #tpu.memory_space<vmem>>, vector<128x128xf32>
      %38 = vector.broadcast %36 : vector<128x1xf32> to vector<128x128xf32>
      %39 = arith.mulf %37, %38 : vector<128x128xf32>
      %40 = arith.truncf %39 : vector<128x128xf32> to vector<128x128xbf16>
      %c0_29 = arith.constant 0 : index
      %c0_30 = arith.constant 0 : index
      %c0_31 = arith.constant 0 : index
      %41 = vector.load %arg7[%c0_29, %c0_30, %c0_31] : memref<1x128x128xbf16, #tpu.memory_space<vmem>>, vector<1x128x128xbf16>
      %42 = vector.shape_cast %41 : vector<1x128x128xbf16> to vector<128x128xbf16>
      %43 = vector.shape_cast %40 : vector<128x128xbf16> to vector<1x128x128xbf16>
      tpu.vector_store %arg7[%c0_29, %c0_30, %c0_31], %43 {strides = array<i32>} : memref<1x128x128xbf16, #tpu.memory_space<vmem>>, vector<1x128x128xbf16>,
    } else {
    }
    return
  }
  func.func @transform_0(%arg0: i32, %arg1: i32, %arg2: i32, %arg3: i32) -> (i32, i32, i32) {
    %c0_i32 = arith.constant 0 : i32
    return %arg0, %arg2, %arg1 : i32, i32, i32
  }
  func.func @transform_1(%arg0: i32, %arg1: i32, %arg2: i32, %arg3: i32) -> (i32, i32, i32) {
    %c2_i32 = arith.constant 2 : i32
    %0 = arith.addi %c2_i32, %arg1 : i32
    %c0_i32 = arith.constant 0 : i32
    return %arg0, %arg3, %0 : i32, i32, i32
  }
  func.func @transform_2(%arg0: i32, %arg1: i32, %arg2: i32, %arg3: i32) -> (i32, i32, i32) {
    %c4_i32 = arith.constant 4 : i32
    %0 = arith.addi %c4_i32, %arg1 : i32
    %c0_i32 = arith.constant 0 : i32
    return %arg0, %arg3, %0 : i32, i32, i32
  }
  func.func @transform_3(%arg0: i32, %arg1: i32, %arg2: i32, %arg3: i32) -> (i32, i32, i32) {
    %c0_i32 = arith.constant 0 : i32
    return %arg0, %arg2, %arg1 : i32, i32, i32
  }
}

</mosaic_0001>

<bundles_post_ra>
// kernel: attention_pallas.3
= control target key start
LH: loop header
LB: loop body
LE: loop exit
PB: predicated region body
PF: predicated region fallthrough
CT: control target
= control target key end

     0   :  { %s1479_s12 = smov 0   ;;  %s1481_s13 = smov 0   ;;  %s1799_s0 = inlined_call_operand.vmem [shape: bf16[256,256], index: 0, kind: input, shape index: {}]   ;;  %s1800_s1 = inlined_call_operand.vmem [shape: bf16[256,768], index: 1, kind: input, shape index: {}]   ;;  %s1801_s2 = inlined_call_operand.vmem [shape: f32[1,768], index: 2, kind: input, shape index: {}]   ;;  %s1802_s3 = inlined_call_operand.vmem [shape: bf16[256,768], index: 3, kind: output, shape index: {}]  }
   0x1   :  { %s1483_s14 = smov 0   ;;  %s1485_s15 = smov 0  }
   0x2   :  { %s1487_s16 = smov 0   ;;  %s1489_s17 = smov 0  }
   0x3   :  { %s1491_s18 = smov 0   ;;  %s1493_s19 = smov 0  }
   0x4   :  { %s1495_s20 = smov 0  }
   0x5 LB: > { %s1107_s21 = sadd.s32 4294967295, %s1457_s20   ;;  %s22_s22 = sadd.s32 1, %s1449_s18  ;;  %s1457_s20 = sphi %s1495_s20, %s13_s20   ;;  %s1453_s19 = sphi %s1493_s19, %s1811_s19   ;;  %s1449_s18 = sphi %s1491_s18, %s1810_s18   ;;  %s1445_s17 = sphi %s1489_s17, %s1809_s17   ;;  %s1441_s16 = sphi %s1487_s16, %s1808_s16   ;;  %s1437_s15 = sphi %s1485_s15, %s1807_s15   ;;  %s1433_s14 = sphi %s1483_s14, %s1806_s14   ;;  %s1429_s13 = sphi %s1481_s13, %s1805_s13   ;;  %s1425_s12 = sphi %s1479_s12, %s1804_s12  }
   0x6   : > { %p23_p0 = scmp.ge.s32.totalorder %s22_s22, 3  ;;  %s25_s23 = sadd.s32 1, %s1453_s19 }
   0x7   : > { %s58_s24 = sadd.s32 1, %s1437_s15  ;;  %p65_p1 = scmp.ne.s32.totalorder %s1437_s15, %s1433_s14 }
   0x8   : > { %s1813_s22 = smov (%p23_p0, %s22_s22), 0  ;;  %s1815_s23 = smov (!%p23_p0, %s25_s23), %s1453_s19 }
   0x9   : > { %s55_s25 = ssub.s32 %s1449_s18, %s1813_s22  ;;  %p66_p2 = scmp.eq.s32.totalorder %s1457_s20, 0 }
   0xa   : > { %p27_p3 = scmp.ge.s32.totalorder %s1815_s23, 2  ;;  %p56_p4 = scmp.eq.s32.totalorder %s55_s25, 0 }
   0xb   : > { %p67_p5 = por %p66_p2, %p65_p1  ;;  %s112_s26 = sadd.s32 1, %s1429_s13 }
   0xc   : > { %s1817_s23 = smov (%p27_p3, %s1815_s23), 0  ;;  %p122_p6 = scmp.ne.s32.totalorder %s1429_s13, %s1425_s12 }
   0xd   : > { %s1540_s27 = scalar_select %p56_p4, %s1437_s15, %s58_s24  }
   0xe   : > { %s107_s28 = ssub.s32 %s1453_s19, %s1817_s23  ;;  %p123_p7 = scmp.eq.s32.totalorder %s1107_s21, 5 }
   0xf   : > { %s109_s29 = sor.u32 %s107_s28, %s55_s25  ;;  %p1110_p10 = scmp.ge.s32.totalorder %s1457_s20, 6 }
  0x10   : > { %p110_p8 = scmp.eq.s32.totalorder %s109_s29, 0  ;;  %p1546_p9 = por %p123_p7, %p122_p6 }
  0x11   : > { %145 = sbr.rel (%p1110_p10) target bundleno = 44 (0x2c), region = 16 }
  0x12   : > { %s1551_s4 = scalar_select %p110_p8, %s1429_s13, %s112_s26  }
  0x18   : > { %158 = sbr.rel (!%p67_p5) target bundleno = 44 (0x2c), region = 24  ;;  %s160_s5 = sand.u32 (%p67_p5), 1, %s1437_s15  }
  0x19   : > { %s1192_s6 = sshll.u32 (%p67_p5), %s1449_s18, 3  ;;  %s1111_s7 = sshll.u32 (%p67_p5), %s160_s5, 8 }
  0x1a   : > { %s1559_s10 = scalar_lea.vmem (%p67_p5), %s1800_s1, %s1192_s6  ;;  %s1564_s11 = scalar_lea.vmem (%p67_p5), [#allocation2], %s1111_s7 }
  0x1b   : > { %v255_v0 = vld [vmem:[%s1559_s10] sm:$0xff] (%p67_p5)  ;;  %v257_v1 = vld [vmem:[%s1559_s10 + $0x18] sm:$0xff] (%p67_p5)  ;;  %v259_v2 = vld [vmem:[%s1559_s10 + $0x30] sm:$0xff] (%p67_p5) }
  0x1c   : > { %256 = vst [vmem:[%s1564_s11] sm:$0xff] (%p67_p5), %v255_v0  ;;  %258 = vst [vmem:[%s1564_s11 + $0x8] sm:$0xff] (%p67_p5), %v257_v1  ;;  %v261_v3 = vld [vmem:[%s1559_s10 + $0x48] sm:$0xff] (%p67_p5)  ;;  %v263_v4 = vld [vmem:[%s1559_s10 + $0x60] sm:$0xff] (%p67_p5) }
  0x1d   : > { %260 = vst [vmem:[%s1564_s11 + $0x10] sm:$0xff] (%p67_p5), %v259_v2  ;;  %v265_v5 = vld [vmem:[%s1559_s10 + $0x78] sm:$0xff] (%p67_p5)  ;;  %262 = vst [vmem:[%s1564_s11 + $0x18] sm:$0xff] (%p67_p5), %v261_v3  ;;  %v267_v6 = vld [vmem:[%s1559_s10 + $0x90] sm:$0xff] (%p67_p5) }
  0x1e   : > { %264 = vst [vmem:[%s1564_s11 + $0x20] sm:$0xff] (%p67_p5), %v263_v4  ;;  %266 = vst [vmem:[%s1564_s11 + $0x28] sm:$0xff] (%p67_p5), %v265_v5  ;;  %v269_v7 = vld [vmem:[%s1559_s10 + $0xa8] sm:$0xff] (%p67_p5)  ;;  %v271_v8 = vld [vmem:[%s1559_s10 + $0xc0] sm:$0xff] (%p67_p5) }
  0x1f   : > { %268 = vst [vmem:[%s1564_s11 + $0x30] sm:$0xff] %v267_v6  ;;  %270 = vst [vmem:[%s1564_s11 + $0x38] sm:$0xff] %v269_v7  ;;  %v273_v9 = vld [vmem:[%s1559_s10 + $0xd8] sm:$0xff]  ;;  %v275_v10 = vld [vmem:[%s1559_s10 + $0xf0] sm:$0xff] }
  0x20   : > { %272 = vst [vmem:[%s1564_s11 + $0x40] sm:$0xff] %v271_v8  ;;  %v277_v11 = vld [vmem:[%s1559_s10 + $0x108] sm:$0xff]  ;;  %274 = vst [vmem:[%s1564_s11 + $0x48] sm:$0xff] %v273_v9  ;;  %v279_v12 = vld [vmem:[%s1559_s10 + $0x120] sm:$0xff] }
  0x21   : > { %276 = vst [vmem:[%s1564_s11 + $0x50] sm:$0xff] %v275_v10  ;;  %278 = vst [vmem:[%s1564_s11 + $0x58] sm:$0xff] %v277_v11  ;;  %v281_v13 = vld [vmem:[%s1559_s10 + $0x138] sm:$0xff]  ;;  %v283_v14 = vld [vmem:[%s1559_s10 + $0x150] sm:$0xff] }
  0x22   : > { %280 = vst [vmem:[%s1564_s11 + $0x60] sm:$0xff] %v279_v12  ;;  %282 = vst [vmem:[%s1564_s11 + $0x68] sm:$0xff] %v281_v13  ;;  %v285_v15 = vld [vmem:[%s1559_s10 + $0x168] sm:$0xff]  ;;  %v287_v16 = vld [vmem:[%s1559_s10 + $0x180] sm:$0xff] }
  0x23   : > { %284 = vst [vmem:[%s1564_s11 + $0x70] sm:$0xff] %v283_v14  ;;  %v289_v17 = vld [vmem:[%s1559_s10 + $0x198] sm:$0xff]  ;;  %286 = vst [vmem:[%s1564_s11 + $0x78] sm:$0xff] %v285_v15  ;;  %v291_v18 = vld [vmem:[%s1559_s10 + $0x1b0] sm:$0xff] }
  0x24   : > { %288 = vst [vmem:[%s1564_s11 + $0x80] sm:$0xff] %v287_v16  ;;  %290 = vst [vmem:[%s1564_s11 + $0x88] sm:$0xff] %v289_v17  ;;  %v293_v19 = vld [vmem:[%s1559_s10 + $0x1c8] sm:$0xff]  ;;  %v295_v20 = vld [vmem:[%s1559_s10 + $0x1e0] sm:$0xff] }
  0x25   : > { %292 = vst [vmem:[%s1564_s11 + $0x90] sm:$0xff] %v291_v18  ;;  %294 = vst [vmem:[%s1564_s11 + $0x98] sm:$0xff] %v293_v19  ;;  %v297_v21 = vld [vmem:[%s1559_s10 + $0x1f8] sm:$0xff]  ;;  %v299_v22 = vld [vmem:[%s1559_s10 + $0x210] sm:$0xff] }
  0x26   : > { %296 = vst [vmem:[%s1564_s11 + $0xa0] sm:$0xff] %v295_v20  ;;  %v301_v23 = vld [vmem:[%s1559_s10 + $0x228] sm:$0xff]  ;;  %298 = vst [vmem:[%s1564_s11 + $0xa8] sm:$0xff] %v297_v21  ;;  %v303_v24 = vld [vmem:[%s1559_s10 + $0x240] sm:$0xff] }
  0x27   : > { %300 = vst [vmem:[%s1564_s11 + $0xb0] sm:$0xff] %v299_v22  ;;  %302 = vst [vmem:[%s1564_s11 + $0xb8] sm:$0xff] %v301_v23  ;;  %v305_v25 = vld [vmem:[%s1559_s10 + $0x258] sm:$0xff]  ;;  %v307_v26 = vld [vmem:[%s1559_s10 + $0x270] sm:$0xff] }
  0x28   : > { %304 = vst [vmem:[%s1564_s11 + $0xc0] sm:$0xff] %v303_v24  ;;  %306 = vst [vmem:[%s1564_s11 + $0xc8] sm:$0xff] %v305_v25  ;;  %v309_v27 = vld [vmem:[%s1559_s10 + $0x288] sm:$0xff]  ;;  %v311_v28 = vld [vmem:[%s1559_s10 + $0x2a0] sm:$0xff] }
  0x29   : > { %308 = vst [vmem:[%s1564_s11 + $0xd0] sm:$0xff] %v307_v26  ;;  %v313_v29 = vld [vmem:[%s1559_s10 + $0x2b8] sm:$0xff]  ;;  %310 = vst [vmem:[%s1564_s11 + $0xd8] sm:$0xff] %v309_v27  ;;  %v315_v30 = vld [vmem:[%s1559_s10 + $0x2d0] sm:$0xff] }
  0x2a   : > { %312 = vst [vmem:[%s1564_s11 + $0xe0] sm:$0xff] %v311_v28  ;;  %314 = vst [vmem:[%s1564_s11 + $0xe8] sm:$0xff] %v313_v29  ;;  %v317_v31 = vld [vmem:[%s1559_s10 + $0x2e8] sm:$0xff] }
  0x2b   : > { %316 = vst [vmem:[%s1564_s11 + $0xf0] sm:$0xff] %v315_v30  ;;  %318 = vst [vmem:[%s1564_s11 + $0xf8] sm:$0xff] %v317_v31 }
  0x2c PF: > { %p1114_p11 = scmp.ge.s32.totalorder %s1457_s20, 1  ;;  %p331_p12 = scmp.lt.s32.totalorder %s1457_s20, 7 }
  0x2e   : > { %p332_p13 = pnand %p1114_p11, %p331_p12 }
  0x2f   : > { %s338_s21 = sand.u32 (!%p332_p13), 1, %s1433_s14   ;;  %s1117_s14 = sshll.u32 (!%p332_p13), %s1445_s17, 4  ;;  %v435_v16 = vlaneseq (!%p332_p13) }
  0x30   : > { %335 = sbr.rel (%p332_p13) target bundleno = 368 (0x170), region = 66  ;;  %s1115_s24 = sshll.u32 (!%p332_p13), %s338_s21, 8 }
  0x31   : > { %s1630_s25 = scalar_lea.vmem (!%p332_p13), [#allocation2], %s1115_s24  ;;  %p371_p0 = scmp.lt.s32.totalorder (!%p332_p13), %s1117_s14, 31  ;;  %v436_v17 = vshrl.u32 (!%p332_p13), %v435_v16, 7 }
  0x32   : > { %v1315_v32 = vld [vmem:[%s1630_s25 + $0x4] ss:$8 sps:$4 sm:$0xff] (!%p332_p13)   ;;  %v1317_v33 = vld [vmem:[%s1630_s25] ss:$8 sps:$4 sm:$0xff] (!%p332_p13)   ;;  %v1318_v34 = vld [vmem:[%s1630_s25 + $0x14] ss:$8 sps:$4 sm:$0xff] (!%p332_p13)  }
  0x33   : > { %685 = vmatprep.subr.bf16.mxu0 (!%p332_p13), %v1315_v32  ;;  %1210 = vmatprep.subr.bf16.mxu1 (!%p332_p13), %v1315_v32  ;;  %v1320_v35 = vld [vmem:[%s1630_s25 + $0x10] ss:$8 sps:$4 sm:$0xff] (!%p332_p13)   ;;  %v1321_v36 = vld [vmem:[%s1630_s25 + $0x24] ss:$8 sps:$4 sm:$0xff] (!%p332_p13)   ;;  %v1323_v37 = vld [vmem:[%s1630_s25 + $0x20] ss:$8 sps:$4 sm:$0xff] (!%p332_p13)  }
  0x34   : > { %686 = vmatpush1.bf16.msra.mxu0 (!%p332_p13), %v1317_v33  ;;  %1226 = vmatpush1.bf16.msra.mxu1 (!%p332_p13), %v1317_v33  ;;  %v1324_v38 = vld [vmem:[%s1630_s25 + $0x34] ss:$8 sps:$4 sm:$0xff] (!%p332_p13)   ;;  %v1326_v39 = vld [vmem:[%s1630_s25 + $0x30] ss:$8 sps:$4 sm:$0xff] (!%p332_p13)   ;;  %v1327_v40 = vld [vmem:[%s1630_s25 + $0x44] ss:$8 sps:$4 sm:$0xff] (!%p332_p13)  }
  0x35   : > { %687 = vmatprep.subr.bf16.mxu0 (!%p332_p13), %v1318_v34  ;;  %1211 = vmatprep.subr.bf16.mxu1 (!%p332_p13), %v1318_v34  ;;  %v1329_v41 = vld [vmem:[%s1630_s25 + $0x40] ss:$8 sps:$4 sm:$0xff] (!%p332_p13)   ;;  %v1330_v42 = vld [vmem:[%s1630_s25 + $0x54] ss:$8 sps:$4 sm:$0xff] (!%p332_p13)   ;;  %v1332_v43 = vld [vmem:[%s1630_s25 + $0x50] ss:$8 sps:$4 sm:$0xff] (!%p332_p13)  }
  0x36   : > { %v1333_v44 = vld [vmem:[%s1630_s25 + $0x64] ss:$8 sps:$4 sm:$0xff] (!%p332_p13)   ;;  %v1335_v46 = vld [vmem:[%s1630_s25 + $0x60] ss:$8 sps:$4 sm:$0xff] (!%p332_p13)   ;;  %v1336_v48 = vld [vmem:[%s1630_s25 + $0x74] ss:$8 sps:$4 sm:$0xff] (!%p332_p13)  }
  0x37   : > { %s1819_s14 = smov (!%p371_p0, %s1117_s14), 31  ;;  %v1338_v49 = vld [vmem:[%s1630_s25 + $0x70] ss:$8 sps:$4 sm:$0xff]   ;;  %v1339_v50 = vld [vmem:[%s1630_s25 + $0x84] ss:$8 sps:$4 sm:$0xff]   ;;  %s1687_s6 = sshll.u32 %s1441_s16, 1 }
  0x38   : > { %688 = vmatpush1.bf16.msra.mxu0 %v1320_v35  ;;  %1227 = vmatpush1.bf16.msra.mxu1 %v1320_v35  ;;  %s1193_s26 = sshll.u32 %s1819_s14, 3  ;;  %v1341_v51 = vld [vmem:[%s1630_s25 + $0x80] ss:$8 sps:$4 sm:$0xff]   ;;  %v1342_v52 = vld [vmem:[%s1630_s25 + $0x94] ss:$8 sps:$4 sm:$0xff]   ;;  %p379_p1 = scmp.lt.s32.totalorder %s1687_s6, 5 }
  0x39   : > { %689 = vmatprep.subr.bf16.mxu0 %v1321_v36  ;;  %1212 = vmatprep.subr.bf16.mxu1 %v1321_v36  ;;  %s1648_s5 = scalar_lea.vmem %s1799_s0, %s1193_s26  ;;  %v1344_v53 = vld [vmem:[%s1630_s25 + $0x90] ss:$8 sps:$4 sm:$0xff]   ;;  %v1345_v54 = vld [vmem:[%s1630_s25 + $0xa4] ss:$8 sps:$4 sm:$0xff]   ;;  %v1347_v55 = vld [vmem:[%s1630_s25 + $0xa0] ss:$8 sps:$4 sm:$0xff]  }
  0x3a   : > { %v1365_v45 = vld [vmem:[%s1648_s5 + $0x4] ss:$8 sps:$4 sm:$0xff]   ;;  %v1348_v56 = vld [vmem:[%s1630_s25 + $0xb4] ss:$8 sps:$4 sm:$0xff]   ;;  %v1350_v57 = vld [vmem:[%s1630_s25 + $0xb0] ss:$8 sps:$4 sm:$0xff]  }
  0x3b   : > { %v1368_v47 = vld [vmem:[%s1648_s5 + $0x44] ss:$8 sps:$4 sm:$0xff]   ;;  %717 = vmatprep.mubr.bf16.mxu0 %v1365_v45  ;;  %v1353_v59 = vld [vmem:[%s1630_s25 + $0xc0] ss:$8 sps:$4 sm:$0xff]   ;;  %v1354_v60 = vld [vmem:[%s1630_s25 + $0xd4] ss:$8 sps:$4 sm:$0xff]  }
  0x3c   : > { %690 = vmatpush1.bf16.msra.mxu0 %v1323_v37  ;;  %1228 = vmatpush1.bf16.msra.mxu1 %v1323_v37  ;;  %v1351_v58 = vld [vmem:[%s1630_s25 + $0xc4] ss:$8 sps:$4 sm:$0xff]   ;;  %v1356_v61 = vld [vmem:[%s1630_s25 + $0xd0] ss:$8 sps:$4 sm:$0xff]   ;;  %v1359_v63 = vld [vmem:[%s1630_s25 + $0xe0] ss:$8 sps:$4 sm:$0xff]  }
  0x3d   : > { %691 = vmatprep.subr.bf16.mxu0 %v1324_v38  ;;  %1213 = vmatprep.subr.bf16.mxu1 %v1324_v38  ;;  %v1357_v62 = vld [vmem:[%s1630_s25 + $0xe4] ss:$8 sps:$4 sm:$0xff]   ;;  %v1360_v0 = vld [vmem:[%s1630_s25 + $0xf4] ss:$8 sps:$4 sm:$0xff]   ;;  %v1362_v1 = vld [vmem:[%s1630_s25 + $0xf0] ss:$8 sps:$4 sm:$0xff]  }
  0x3e   : > { %757 = vmatprep.mubr.bf16.mxu1 %v1368_v47  ;;  %v1363_v2 = vld [vmem:[%s1648_s5] ss:$8 sps:$4 sm:$0xff]   ;;  %v1369_v4 = vld [vmem:[%s1648_s5 + $0x14] ss:$8 sps:$4 sm:$0xff]   ;;  %v1373_v6 = vld [vmem:[%s1648_s5 + $0x10] ss:$8 sps:$4 sm:$0xff]  }
  0x3f   : > { %v1366_v3 = vld [vmem:[%s1648_s5 + $0x40] ss:$8 sps:$4 sm:$0xff]   ;;  %v1371_v5 = vld [vmem:[%s1648_s5 + $0x54] ss:$8 sps:$4 sm:$0xff]   ;;  %v1374_v7 = vld [vmem:[%s1648_s5 + $0x50] ss:$8 sps:$4 sm:$0xff]  }
  0x40   : > { %692 = vmatpush1.bf16.msra.mxu0 %v1326_v39  ;;  %1229 = vmatpush1.bf16.msra.mxu1 %v1326_v39  ;;  %v1375_v8 = vld [vmem:[%s1648_s5 + $0x24] ss:$8 sps:$4 sm:$0xff]   ;;  %v1379_v10 = vld [vmem:[%s1648_s5 + $0x20] ss:$8 sps:$4 sm:$0xff]   ;;  %v1381_v12 = vld [vmem:[%s1648_s5 + $0x34] ss:$8 sps:$4 sm:$0xff]  }
  0x41   : > { %693 = vmatprep.subr.bf16.mxu0 %v1327_v40  ;;  %1214 = vmatprep.subr.bf16.mxu1 %v1327_v40  ;;  %v1377_v9 = vld [vmem:[%s1648_s5 + $0x64] ss:$8 sps:$4 sm:$0xff]   ;;  %v1380_v11 = vld [vmem:[%s1648_s5 + $0x60] ss:$8 sps:$4 sm:$0xff]   ;;  %v1383_v13 = vld [vmem:[%s1648_s5 + $0x74] ss:$8 sps:$4 sm:$0xff]  }
  0x42   : > { %v1385_v14 = vld [vmem:[%s1648_s5 + $0x30] ss:$8 sps:$4 sm:$0xff]   ;;  %s380_s7 = scalar_select %p379_p1, %s1687_s6, 5  ;;  %v437_v18 = vsub.s32 0, %v436_v17  ;;  %v441_v20 = vsub.s32 1, %v436_v17 }
  0x43   : > { %v1386_v15 = vld [vmem:[%s1648_s5 + $0x70] ss:$8 sps:$4 sm:$0xff]   ;;  %s367_s11 = sand.u32 1, %s1425_s12   ;;  %s1242_s21 = smul.u32 (%p1546_p9), 96, %s1445_s17 }
  0x44   : > { %694 = vmatpush1.bf16.msra.mxu0 %v1329_v41  ;;  %1230 = vmatpush1.bf16.msra.mxu1 %v1329_v41  ;;  %s381_s10 = scalar_lea.vmem %s1801_s2, %s380_s7  ;;  %s1116_s16 = sshll.u32 %s367_s11, 7 }
  0x45   : > { %695 = vmatprep.subr.bf16.mxu0 %v1330_v42  ;;  %1215 = vmatprep.subr.bf16.mxu1 %v1330_v42  ;;  %v433_v19 = vld [vmem:[%s381_s10] sm:$0x3]  ;;  %s1707_s12 = scalar_lea.vmem [#allocation3], %s1116_s16  ;;  %s920_s30 = sadd.s32 (%p1546_p9), %s1242_s21, %s1687_s6 }
  0x46   : > { %v1694_v21 = vrot.slane %v433_v19, %v437_v18  ;;  %v1697_v22 = vrot.slane %v433_v19, %v441_v20  ;;  %s1189_s24 = sshll.u32 (%p1546_p9), %s920_s30, 2 }
  0x47   : > { %s922_s17 = scalar_lea.vmem (%p1546_p9), %s1802_s3, %s1189_s24 }
  0x48   : > { %696 = vmatpush1.bf16.msra.mxu0 %v1332_v43  ;;  %1231 = vmatpush1.bf16.msra.mxu1 %v1332_v43 }
  0x49   : > { %697 = vmatprep.subr.bf16.mxu0 %v1333_v44  ;;  %1216 = vmatprep.subr.bf16.mxu1 %v1333_v44 }
  0x4c   : > { %698 = vmatpush1.bf16.msra.mxu0 %v1335_v46  ;;  %1232 = vmatpush1.bf16.msra.mxu1 %v1335_v46 }
  0x4d   : > { %699 = vmatprep.subr.bf16.mxu0 %v1336_v48  ;;  %1217 = vmatprep.subr.bf16.mxu1 %v1336_v48 }
  0x50   : > { %700 = vmatpush1.bf16.msra.mxu0 %v1338_v49  ;;  %1233 = vmatpush1.bf16.msra.mxu1 %v1338_v49 }
  0x51   : > { %701 = vmatprep.subr.bf16.mxu0 %v1339_v50  ;;  %1218 = vmatprep.subr.bf16.mxu1 %v1339_v50 }
  0x54   : > { %702 = vmatpush1.bf16.msra.mxu0 %v1341_v51  ;;  %1234 = vmatpush1.bf16.msra.mxu1 %v1341_v51 }
  0x55   : > { %703 = vmatprep.subr.bf16.mxu0 %v1342_v52  ;;  %1219 = vmatprep.subr.bf16.mxu1 %v1342_v52 }
  0x58   : > { %704 = vmatpush1.bf16.msra.mxu0 %v1344_v53  ;;  %1235 = vmatpush1.bf16.msra.mxu1 %v1344_v53 }
  0x59   : > { %705 = vmatprep.subr.bf16.mxu0 %v1345_v54  ;;  %1220 = vmatprep.subr.bf16.mxu1 %v1345_v54 }
  0x5c   : > { %706 = vmatpush1.bf16.msra.mxu0 %v1347_v55  ;;  %1236 = vmatpush1.bf16.msra.mxu1 %v1347_v55 }
  0x5d   : > { %707 = vmatprep.subr.bf16.mxu0 %v1348_v56  ;;  %1221 = vmatprep.subr.bf16.mxu1 %v1348_v56 }
  0x60   : > { %708 = vmatpush1.bf16.msra.mxu0 %v1350_v57  ;;  %1237 = vmatpush1.bf16.msra.mxu1 %v1350_v57 }
  0x61   : > { %709 = vmatprep.subr.bf16.mxu0 %v1351_v58  ;;  %1222 = vmatprep.subr.bf16.mxu1 %v1351_v58 }
  0x64   : > { %710 = vmatpush1.bf16.msra.mxu0 %v1353_v59  ;;  %1238 = vmatpush1.bf16.msra.mxu1 %v1353_v59 }
  0x65   : > { %711 = vmatprep.subr.bf16.mxu0 %v1354_v60  ;;  %1223 = vmatprep.subr.bf16.mxu1 %v1354_v60 }
  0x68   : > { %712 = vmatpush1.bf16.msra.mxu0 %v1356_v61  ;;  %1239 = vmatpush1.bf16.msra.mxu1 %v1356_v61 }
  0x69   : > { %713 = vmatprep.subr.bf16.mxu0 %v1357_v62  ;;  %1224 = vmatprep.subr.bf16.mxu1 %v1357_v62 }
  0x6c   : > { %714 = vmatpush1.bf16.msra.mxu0 %v1359_v63  ;;  %1240 = vmatpush1.bf16.msra.mxu1 %v1359_v63 }
  0x6d   : > { %715 = vmatprep.subr.bf16.mxu0 %v1360_v0  ;;  %1225 = vmatprep.subr.bf16.mxu1 %v1360_v0 }
  0x70   : > { %716 = vmatpush1.bf16.msra.mxu0 %v1362_v1  ;;  %1241 = vmatpush1.bf16.msra.mxu1 %v1362_v1 }
  0x73   : > { %718 = vmatmul.mubr.bf16.vlgmr.msra.gmra.mrb[0].mxu0 %v1363_v2  ;;  %758 = vmatmul.mubr.bf16.vlgmr.msra.gmra.mrb[0].mxu1 %v1366_v3 }
  0x74   : > { %727 = vmatprep.mubr.bf16.mxu0 %v1369_v4  ;;  %767 = vmatprep.mubr.bf16.mxu1 %v1371_v5 }
  0x7b   : > { %728 = vmatmul.mubr.bf16.gmra.mrb[4].mxu0 %v1373_v6  ;;  %768 = vmatmul.mubr.bf16.gmra.mrb[4].mxu1 %v1374_v7 }
  0x7c   : > { %737 = vmatprep.mubr.bf16.mxu0 %v1375_v8  ;;  %777 = vmatprep.mubr.bf16.mxu1 %v1377_v9 }
  0x83   : > { %738 = vmatmul.mubr.bf16.gmra.mrb[8].mxu0 %v1379_v10  ;;  %778 = vmatmul.mubr.bf16.gmra.mrb[8].mxu1 %v1380_v11 }
  0x84   : > { %747 = vmatprep.mubr.bf16.mxu0 %v1381_v12  ;;  %787 = vmatprep.mubr.bf16.mxu1 %v1383_v13 }
  0x8b   : > { %748 = vmatmul.mubr.bf16.gmra.mrb[12].mxu0 %v1385_v14  ;;  %788 = vmatmul.mubr.bf16.gmra.mrb[12].mxu1 %v1386_v15 }
 0x146   : > { %v719_v23 = vpop.f32.mrb[0].mxu0  ;;  %v759_v24 = vpop.f32.mrb[0].mxu1 }
 0x147   : > { %v720_v25 = vadd.f32 %v719_v23, %v1694_v21  ;;  %v760_v26 = vadd.f32 %v759_v24, %v1694_v21  ;;  %v721_v27 = vpop.f32.mrb[1].mxu0  ;;  %v761_v28 = vpop.f32.mrb[1].mxu1 }
 0x148   : > { %v722_v29 = vadd.f32 %v721_v27, %v1697_v22  ;;  %v762_v30 = vadd.f32 %v761_v28, %v1697_v22  ;;  %v723_v31 = vpop.f32.mrb[2].mxu0  ;;  %v763_v32 = vpop.f32.mrb[2].mxu1 }
 0x149   : > { %v724_v33 = vadd.f32 %v723_v31, %v1694_v21  ;;  %v764_v34 = vadd.f32 %v763_v32, %v1694_v21  ;;  %v725_v35 = vpop.f32.mrb[3].mxu0  ;;  %v765_v36 = vpop.f32.mrb[3].mxu1 }
 0x14a   : > { %v1194_v37 = vpack.c.bf16 %v722_v29, %v720_v25  ;;  %v1202_v38 = vpack.c.bf16 %v762_v30, %v760_v26  ;;  %v726_v39 = vadd.f32 %v725_v35, %v1697_v22  ;;  %v766_v40 = vadd.f32 %v765_v36, %v1697_v22 }
 0x14c   : > { %894 = vst [vmem:[%s1707_s12] sm:$0xff] %v1194_v37  ;;  %902 = vst [vmem:[%s1707_s12 + $0x40] sm:$0xff] %v1202_v38  ;;  %v1195_v41 = vpack.c.bf16 %v726_v39, %v724_v33  ;;  %v1203_v42 = vpack.c.bf16 %v766_v40, %v764_v34 }
 0x14e   : > { %895 = vst [vmem:[%s1707_s12 + $0x8] sm:$0xff] %v1195_v41  ;;  %903 = vst [vmem:[%s1707_s12 + $0x48] sm:$0xff] %v1203_v42  ;;  %v729_v43 = vpop.f32.mrb[4].mxu0  ;;  %v769_v44 = vpop.f32.mrb[4].mxu1 }
 0x14f   : > { %v730_v45 = vadd.f32 %v729_v43, %v1694_v21  ;;  %v770_v46 = vadd.f32 %v769_v44, %v1694_v21  ;;  %v731_v47 = vpop.f32.mrb[5].mxu0  ;;  %v771_v48 = vpop.f32.mrb[5].mxu1 }
 0x150   : > { %v732_v49 = vadd.f32 %v731_v47, %v1697_v22  ;;  %v772_v50 = vadd.f32 %v771_v48, %v1697_v22  ;;  %v733_v51 = vpop.f32.mrb[6].mxu0  ;;  %v773_v52 = vpop.f32.mrb[6].mxu1 }
 0x151   : > { %v734_v53 = vadd.f32 %v733_v51, %v1694_v21  ;;  %v774_v54 = vadd.f32 %v773_v52, %v1694_v21  ;;  %v735_v55 = vpop.f32.mrb[7].mxu0  ;;  %v775_v56 = vpop.f32.mrb[7].mxu1 }
 0x152   : > { %v1196_v57 = vpack.c.bf16 %v732_v49, %v730_v45  ;;  %v1204_v58 = vpack.c.bf16 %v772_v50, %v770_v46  ;;  %v736_v59 = vadd.f32 %v735_v55, %v1697_v22  ;;  %v776_v60 = vadd.f32 %v775_v56, %v1697_v22 }
 0x153   : > { %v996_v47 = vld [vmem:[%s1707_s12 + $0x40] sm:$0xff] (%p1546_p9) }
 0x154   : > { %896 = vst [vmem:[%s1707_s12 + $0x10] sm:$0xff] %v1196_v57  ;;  %904 = vst [vmem:[%s1707_s12 + $0x50] sm:$0xff] %v1204_v58  ;;  %v1197_v61 = vpack.c.bf16 %v736_v59, %v734_v53  ;;  %v1205_v62 = vpack.c.bf16 %v776_v60, %v774_v54 }
 0x155   : > { %v998_v48 = vld [vmem:[%s1707_s12 + $0x48] sm:$0xff] (%p1546_p9)  ;;  %997 = vst [vmem:[%s922_s17 + $0xc0] sm:$0xff] (%p1546_p9), %v996_v47 }
 0x156   : > { %897 = vst [vmem:[%s1707_s12 + $0x18] sm:$0xff] %v1197_v61  ;;  %905 = vst [vmem:[%s1707_s12 + $0x58] sm:$0xff] %v1205_v62  ;;  %v739_v63 = vpop.f32.mrb[8].mxu0  ;;  %v779_v0 = vpop.f32.mrb[8].mxu1 }
 0x157   : > { %v740_v1 = vadd.f32 %v739_v63, %v1694_v21  ;;  %v780_v2 = vadd.f32 %v779_v0, %v1694_v21  ;;  %v741_v3 = vpop.f32.mrb[9].mxu0  ;;  %v781_v4 = vpop.f32.mrb[9].mxu1  ;;  %999 = vst [vmem:[%s922_s17 + $0xd8] sm:$0xff] (%p1546_p9), %v998_v48 }
 0x158   : > { %v742_v5 = vadd.f32 %v741_v3, %v1697_v22  ;;  %v782_v6 = vadd.f32 %v781_v4, %v1697_v22  ;;  %v743_v7 = vpop.f32.mrb[10].mxu0  ;;  %v783_v8 = vpop.f32.mrb[10].mxu1 }
 0x159   : > { %v744_v9 = vadd.f32 %v743_v7, %v1694_v21  ;;  %v784_v10 = vadd.f32 %v783_v8, %v1694_v21  ;;  %v745_v11 = vpop.f32.mrb[11].mxu0  ;;  %v785_v12 = vpop.f32.mrb[11].mxu1 }
 0x15a   : > { %v1198_v13 = vpack.c.bf16 %v742_v5, %v740_v1  ;;  %v1206_v14 = vpack.c.bf16 %v782_v6, %v780_v2  ;;  %v746_v15 = vadd.f32 %v745_v11, %v1697_v22  ;;  %v786_v16 = vadd.f32 %v785_v12, %v1697_v22 }
 0x15b   : > { %v984_v41 = vld [vmem:[%s1707_s12 + $0x10] sm:$0xff] (%p1546_p9) }
 0x15c   : > { %898 = vst [vmem:[%s1707_s12 + $0x20] sm:$0xff] %v1198_v13  ;;  %906 = vst [vmem:[%s1707_s12 + $0x60] sm:$0xff] %v1206_v14  ;;  %v1199_v17 = vpack.c.bf16 %v746_v15, %v744_v9  ;;  %v1207_v18 = vpack.c.bf16 %v786_v16, %v784_v10  ;;  %v1000_v49 = vld [vmem:[%s1707_s12 + $0x50] sm:$0xff] (%p1546_p9) }
 0x15d   : > { %v986_v42 = vld [vmem:[%s1707_s12 + $0x18] sm:$0xff] (%p1546_p9)  ;;  %985 = vst [vmem:[%s922_s17 + $0x30] sm:$0xff] (%p1546_p9), %v984_v41  ;;  %1001 = vst [vmem:[%s922_s17 + $0xf0] sm:$0xff] (%p1546_p9), %v1000_v49 }
 0x15e   : > { %899 = vst [vmem:[%s1707_s12 + $0x28] sm:$0xff] %v1199_v17  ;;  %907 = vst [vmem:[%s1707_s12 + $0x68] sm:$0xff] %v1207_v18  ;;  %v749_v19 = vpop.f32.mrb[12].mxu0  ;;  %v789_v20 = vpop.f32.mrb[12].mxu1  ;;  %v1002_v50 = vld [vmem:[%s1707_s12 + $0x58] sm:$0xff] (%p1546_p9) }
 0x15f   : > { %v750_v23 = vadd.f32 %v749_v19, %v1694_v21  ;;  %v790_v24 = vadd.f32 %v789_v20, %v1694_v21  ;;  %v751_v25 = vpop.f32.mrb[13].mxu0  ;;  %v791_v26 = vpop.f32.mrb[13].mxu1  ;;  %987 = vst [vmem:[%s922_s17 + $0x48] sm:$0xff] (%p1546_p9), %v986_v42  ;;  %1003 = vst [vmem:[%s922_s17 + $0x108] sm:$0xff] (%p1546_p9), %v1002_v50 }
 0x160   : > { %v752_v27 = vadd.f32 %v751_v25, %v1697_v22  ;;  %v792_v28 = vadd.f32 %v791_v26, %v1697_v22  ;;  %v753_v29 = vpop.f32.mrb[14].mxu0  ;;  %v793_v30 = vpop.f32.mrb[14].mxu1  ;;  %916 = sbr.rel (!%p1546_p9) target bundleno = 368 (0x170), region = 74 }
 0x161   : > { %v754_v31 = vadd.f32 %v753_v29, %v1694_v21  ;;  %v794_v32 = vadd.f32 %v793_v30, %v1694_v21  ;;  %v755_v33 = vpop.f32.mrb[15].mxu0  ;;  %v795_v34 = vpop.f32.mrb[15].mxu1  ;;  %v980_v21 = vld [vmem:[%s1707_s12] sm:$0xff] (%p1546_p9) }
 0x162   : > { %v1200_v35 = vpack.c.bf16 %v752_v27, %v750_v23  ;;  %v1208_v36 = vpack.c.bf16 %v792_v28, %v790_v24  ;;  %v756_v37 = vadd.f32 %v755_v33, %v1697_v22  ;;  %v796_v38 = vadd.f32 %v795_v34, %v1697_v22  ;;  %v982_v22 = vld [vmem:[%s1707_s12 + $0x8] sm:$0xff] (%p1546_p9)  ;;  %981 = vst [vmem:[%s922_s17] sm:$0xff] (%p1546_p9), %v980_v21 }
 0x163   : > { %v988_v43 = vld [vmem:[%s1707_s12 + $0x20] sm:$0xff] (%p1546_p9)  ;;  %983 = vst [vmem:[%s922_s17 + $0x18] sm:$0xff] (%p1546_p9), %v982_v22 }
 0x164   : > { %900 = vst [vmem:[%s1707_s12 + $0x30] sm:$0xff] %v1200_v35  ;;  %908 = vst [vmem:[%s1707_s12 + $0x70] sm:$0xff] %v1208_v36  ;;  %v1201_v39 = vpack.c.bf16 %v756_v37, %v754_v31  ;;  %v1209_v40 = vpack.c.bf16 %v796_v38, %v794_v32  ;;  %v1004_v51 = vld [vmem:[%s1707_s12 + $0x60] sm:$0xff] (%p1546_p9) }
 0x165   : > { %v990_v44 = vld [vmem:[%s1707_s12 + $0x28] sm:$0xff] (%p1546_p9)  ;;  %989 = vst [vmem:[%s922_s17 + $0x60] sm:$0xff] (%p1546_p9), %v988_v43  ;;  %1005 = vst [vmem:[%s922_s17 + $0x120] sm:$0xff] (%p1546_p9), %v1004_v51 }
 0x166   : > { %901 = vst [vmem:[%s1707_s12 + $0x38] sm:$0xff] %v1201_v39  ;;  %909 = vst [vmem:[%s1707_s12 + $0x78] sm:$0xff] %v1209_v40  ;;  %v1006_v52 = vld [vmem:[%s1707_s12 + $0x68] sm:$0xff] (%p1546_p9) }
 0x167   : > { %991 = vst [vmem:[%s922_s17 + $0x78] sm:$0xff] %v990_v44  ;;  %1007 = vst [vmem:[%s922_s17 + $0x138] sm:$0xff] %v1006_v52 }
 0x16b   : > { %v992_v45 = vld [vmem:[%s1707_s12 + $0x30] sm:$0xff] }
 0x16c   : > { %v1008_v53 = vld [vmem:[%s1707_s12 + $0x70] sm:$0xff]  ;;  %993 = vst [vmem:[%s922_s17 + $0x90] sm:$0xff] %v992_v45 }
 0x16d   : > { %v994_v46 = vld [vmem:[%s1707_s12 + $0x38] sm:$0xff]  ;;  %1009 = vst [vmem:[%s922_s17 + $0x150] sm:$0xff] %v1008_v53 }
 0x16e   : > { %995 = vst [vmem:[%s922_s17 + $0xa8] sm:$0xff] %v994_v46  ;;  %v1010_v54 = vld [vmem:[%s1707_s12 + $0x78] sm:$0xff] }
 0x16f   : > { %1011 = vst [vmem:[%s922_s17 + $0x168] sm:$0xff] %v1010_v54 }
 0x170 PF: > { %s13_s20 = sadd.s32 1, %s1457_s20   ;;  %s1804_s12 = smov %s1429_s13 }
 0x171   : > { %p10_p2 = scmp.ge.s32.totalorder %s13_s20, 8   ;;  %s1805_s13 = smov %s1551_s4 }
 0x172   : > { %s1806_s14 = smov %s1437_s15  ;;  %s1807_s15 = smov %s1540_s27 }
 0x173   : > { %s1808_s16 = smov %s1449_s18  ;;  %s1809_s17 = smov %s1453_s19 }
 0x174   : > { %s1810_s18 = smov %s1813_s22  ;;  %s1811_s19 = smov %s1817_s23 }
 0x175   :  { %12 = sbr.rel (!%p10_p2) target bundleno = 5 (0x5), region = 149 }

// kernel: attention_pallas.5
= control target key start
LH: loop header
LB: loop body
LE: loop exit
PB: predicated region body
PF: predicated region fallthrough
CT: control target
= control target key end

     0   :  { %8 = vsyncpa [#allocation3], 0  ;;  %s1431_s0 = inlined_call_operand.vmem [shape: bf16[256,256], index: 0, kind: input, shape index: {}]   ;;  %s1432_s1 = inlined_call_operand.vmem [shape: bf16[256,256], index: 1, kind: input, shape index: {}]   ;;  %s1433_s2 = inlined_call_operand.vmem [shape: f32[1,256], index: 2, kind: input, shape index: {}]   ;;  %s1434_s3 = inlined_call_operand.hbm [shape: f32[256,256], index: 3, kind: output, shape index: {}]  }
   0x1   :  { %10 = vsyncpa [#allocation3 + $0x1], 0  ;;  %s1125_s12 = smov 0   ;;  %s1127_s13 = smov 0  }
   0x2   :  { %s1129_s14 = smov 0   ;;  %s1131_s15 = smov 0  }
   0x3   :  { %s1133_s16 = smov 0   ;;  %s1135_s17 = smov 0  }
   0x4 LB: > { %s793_s18 = sadd.s32 4294967295, %s1100_s17   ;;  %s794_s19 = sadd.s32 4294967294, %s1100_s17   ;;  %s1100_s17 = sphi %s1135_s17, %s16_s17   ;;  %s1096_s16 = sphi %s1133_s16, %s1441_s16   ;;  %s1092_s15 = sphi %s1131_s15, %s1440_s15   ;;  %s1088_s14 = sphi %s1129_s14, %s1439_s14   ;;  %s1084_s13 = sphi %s1127_s13, %s1438_s13   ;;  %s1080_s12 = sphi %s1125_s12, %s1437_s12  }
   0x5   : > { %s28_s20 = sadd.s32 1, %s1096_s16  ;;  %s115_s21 = sadd.s32 1, %s1088_s14 }
   0x6   : > { %p30_p0 = scmp.ge.s32.totalorder %s28_s20, 2  ;;  %p125_p1 = scmp.ne.s32.totalorder %s1088_s14, %s1084_s13 }
   0x7   : > { %p126_p2 = scmp.eq.s32.totalorder %s793_s18, 1  ;;  %p131_p3 = scmp.ne.s32.totalorder %s1084_s13, %s1080_s12 }
   0x8   : > { %s1443_s20 = smov (%p30_p0, %s28_s20), 0  ;;  %p132_p5 = scmp.eq.s32.totalorder %s794_s19, 1 }
   0x9   : > { %p1165_p4 = por %p126_p2, %p125_p1  ;;  %s110_s23 = ssub.s32 %s1096_s16, %s1443_s20 }
   0xa   : > { %p799_p6 = scmp.ge.s32.totalorder %s1100_s17, 1  ;;  %p113_p7 = scmp.eq.s32.totalorder %s110_s23, 0 }
   0xb   : > { %p1172_p8 = por %p132_p5, %p131_p3  ;;  %p177_p9 = scmp.lt.s32.totalorder %s1100_s17, 3 }
   0xc   : > { %s1178_s25 = scalar_select %p113_p7, %s1088_s14, %s115_s21  }
   0xd   : > { %p178_p10 = pnand %p799_p6, %p177_p9 }
   0xe   : > { %v950_v0 = vld [vmem:[%s1432_s1 + $0x4] ss:$8 sps:$4 sm:$0xff] (!%p178_p10)   ;;  %v952_v1 = vld [vmem:[%s1432_s1] ss:$8 sps:$4 sm:$0xff] (!%p178_p10)   ;;  %v953_v2 = vld [vmem:[%s1432_s1 + $0x14] ss:$8 sps:$4 sm:$0xff] (!%p178_p10)   ;;  %v281_v48 = vlaneseq (!%p178_p10) }
   0xf   : > { %181 = sbr.rel (%p178_p10) target bundleno = 335 (0x14f), region = 32  ;;  %531 = vmatprep.subr.bf16.mxu0 (!%p178_p10), %v950_v0  ;;  %861 = vmatprep.subr.bf16.mxu1 (!%p178_p10), %v950_v0  ;;  %v955_v3 = vld [vmem:[%s1432_s1 + $0x10] ss:$8 sps:$4 sm:$0xff] (!%p178_p10)   ;;  %v956_v4 = vld [vmem:[%s1432_s1 + $0x24] ss:$8 sps:$4 sm:$0xff] (!%p178_p10)   ;;  %s801_s9 = sshll.u32 (!%p178_p10), %s1092_s15, 4 }
  0x10   : > { %532 = vmatpush1.bf16.msra.mxu0 (!%p178_p10), %v952_v1  ;;  %877 = vmatpush1.bf16.msra.mxu1 (!%p178_p10), %v952_v1  ;;  %v958_v5 = vld [vmem:[%s1432_s1 + $0x20] ss:$8 sps:$4 sm:$0xff] (!%p178_p10)   ;;  %v959_v6 = vld [vmem:[%s1432_s1 + $0x34] ss:$8 sps:$4 sm:$0xff] (!%p178_p10)   ;;  %p212_p11 = scmp.lt.s32.totalorder (!%p178_p10), %s801_s9, 31  ;;  %v282_v49 = vshrl.u32 (!%p178_p10), %v281_v48, 7 }
  0x11   : > { %533 = vmatprep.subr.bf16.mxu0 (!%p178_p10), %v953_v2  ;;  %862 = vmatprep.subr.bf16.mxu1 (!%p178_p10), %v953_v2  ;;  %v961_v7 = vld [vmem:[%s1432_s1 + $0x30] ss:$8 sps:$4 sm:$0xff] (!%p178_p10)   ;;  %v962_v8 = vld [vmem:[%s1432_s1 + $0x44] ss:$8 sps:$4 sm:$0xff] (!%p178_p10)   ;;  %v964_v9 = vld [vmem:[%s1432_s1 + $0x40] ss:$8 sps:$4 sm:$0xff] (!%p178_p10)  }
  0x12   : > { %v965_v10 = vld [vmem:[%s1432_s1 + $0x54] ss:$8 sps:$4 sm:$0xff] (!%p178_p10)   ;;  %v967_v11 = vld [vmem:[%s1432_s1 + $0x50] ss:$8 sps:$4 sm:$0xff] (!%p178_p10)   ;;  %v968_v12 = vld [vmem:[%s1432_s1 + $0x64] ss:$8 sps:$4 sm:$0xff] (!%p178_p10)  }
  0x13   : > { %v970_v14 = vld [vmem:[%s1432_s1 + $0x60] ss:$8 sps:$4 sm:$0xff] (!%p178_p10)   ;;  %v971_v16 = vld [vmem:[%s1432_s1 + $0x74] ss:$8 sps:$4 sm:$0xff] (!%p178_p10)   ;;  %v973_v17 = vld [vmem:[%s1432_s1 + $0x70] ss:$8 sps:$4 sm:$0xff] (!%p178_p10)  }
  0x14   : > { %534 = vmatpush1.bf16.msra.mxu0 (!%p178_p10), %v955_v3  ;;  %878 = vmatpush1.bf16.msra.mxu1 (!%p178_p10), %v955_v3  ;;  %v974_v18 = vld [vmem:[%s1432_s1 + $0x84] ss:$8 sps:$4 sm:$0xff] (!%p178_p10)   ;;  %v976_v19 = vld [vmem:[%s1432_s1 + $0x80] ss:$8 sps:$4 sm:$0xff] (!%p178_p10)   ;;  %v977_v20 = vld [vmem:[%s1432_s1 + $0x94] ss:$8 sps:$4 sm:$0xff] (!%p178_p10)  }
  0x15   : > { %535 = vmatprep.subr.bf16.mxu0 (!%p178_p10), %v956_v4  ;;  %863 = vmatprep.subr.bf16.mxu1 (!%p178_p10), %v956_v4  ;;  %v979_v21 = vld [vmem:[%s1432_s1 + $0x90] ss:$8 sps:$4 sm:$0xff] (!%p178_p10)   ;;  %v980_v22 = vld [vmem:[%s1432_s1 + $0xa4] ss:$8 sps:$4 sm:$0xff] (!%p178_p10)   ;;  %v982_v23 = vld [vmem:[%s1432_s1 + $0xa0] ss:$8 sps:$4 sm:$0xff] (!%p178_p10)  }
  0x16   : > { %s1445_s9 = smov (!%p212_p11, %s801_s9), 31  ;;  %v983_v24 = vld [vmem:[%s1432_s1 + $0xb4] ss:$8 sps:$4 sm:$0xff]   ;;  %v985_v25 = vld [vmem:[%s1432_s1 + $0xb0] ss:$8 sps:$4 sm:$0xff]   ;;  %v283_v50 = vsub.s32 0, %v282_v49 }
  0x17   : > { %s858_s5 = sshll.u32 %s1445_s9, 3  ;;  %v986_v26 = vld [vmem:[%s1432_s1 + $0xc4] ss:$8 sps:$4 sm:$0xff]   ;;  %v988_v27 = vld [vmem:[%s1432_s1 + $0xc0] ss:$8 sps:$4 sm:$0xff]   ;;  %s208_s29 = sand.u32 1, %s1084_s13  }
  0x18   : > { %536 = vmatpush1.bf16.msra.mxu0 %v958_v5  ;;  %879 = vmatpush1.bf16.msra.mxu1 %v958_v5  ;;  %s1220_s11 = scalar_lea.vmem %s1431_s0, %s858_s5  ;;  %v989_v28 = vld [vmem:[%s1432_s1 + $0xd4] ss:$8 sps:$4 sm:$0xff]   ;;  %v991_v29 = vld [vmem:[%s1432_s1 + $0xd0] ss:$8 sps:$4 sm:$0xff]   ;;  %v992_v30 = vld [vmem:[%s1432_s1 + $0xe4] ss:$8 sps:$4 sm:$0xff]  }
  0x19   : > { %537 = vmatprep.subr.bf16.mxu0 %v959_v6  ;;  %864 = vmatprep.subr.bf16.mxu1 %v959_v6  ;;  %v1000_v13 = vld [vmem:[%s1220_s11 + $0x4] ss:$8 sps:$4 sm:$0xff]   ;;  %v994_v31 = vld [vmem:[%s1432_s1 + $0xe0] ss:$8 sps:$4 sm:$0xff]   ;;  %v995_v32 = vld [vmem:[%s1432_s1 + $0xf4] ss:$8 sps:$4 sm:$0xff]  }
  0x1a   : > { %v1003_v15 = vld [vmem:[%s1220_s11 + $0x44] ss:$8 sps:$4 sm:$0xff]   ;;  %563 = vmatprep.mubr.bf16.mxu0 %v1000_v13  ;;  %v997_v33 = vld [vmem:[%s1432_s1 + $0xf0] ss:$8 sps:$4 sm:$0xff]   ;;  %v998_v34 = vld [vmem:[%s1220_s11] ss:$8 sps:$4 sm:$0xff]  }
  0x1b   : > { %603 = vmatprep.mubr.bf16.mxu1 %v1003_v15  ;;  %v1001_v35 = vld [vmem:[%s1220_s11 + $0x40] ss:$8 sps:$4 sm:$0xff]   ;;  %v1004_v36 = vld [vmem:[%s1220_s11 + $0x14] ss:$8 sps:$4 sm:$0xff]   ;;  %v1008_v38 = vld [vmem:[%s1220_s11 + $0x10] ss:$8 sps:$4 sm:$0xff]  }
  0x1c   : > { %538 = vmatpush1.bf16.msra.mxu0 %v961_v7  ;;  %880 = vmatpush1.bf16.msra.mxu1 %v961_v7  ;;  %v1006_v37 = vld [vmem:[%s1220_s11 + $0x54] ss:$8 sps:$4 sm:$0xff]   ;;  %v1009_v39 = vld [vmem:[%s1220_s11 + $0x50] ss:$8 sps:$4 sm:$0xff]   ;;  %v1010_v40 = vld [vmem:[%s1220_s11 + $0x24] ss:$8 sps:$4 sm:$0xff]  }
  0x1d   : > { %539 = vmatprep.subr.bf16.mxu0 %v962_v8  ;;  %865 = vmatprep.subr.bf16.mxu1 %v962_v8  ;;  %v1012_v41 = vld [vmem:[%s1220_s11 + $0x64] ss:$8 sps:$4 sm:$0xff]   ;;  %v1014_v42 = vld [vmem:[%s1220_s11 + $0x20] ss:$8 sps:$4 sm:$0xff]   ;;  %v1016_v44 = vld [vmem:[%s1220_s11 + $0x34] ss:$8 sps:$4 sm:$0xff]  }
  0x1e   : > { %v1015_v43 = vld [vmem:[%s1220_s11 + $0x60] ss:$8 sps:$4 sm:$0xff]   ;;  %v1018_v45 = vld [vmem:[%s1220_s11 + $0x74] ss:$8 sps:$4 sm:$0xff]   ;;  %v1020_v46 = vld [vmem:[%s1220_s11 + $0x30] ss:$8 sps:$4 sm:$0xff]  }
  0x1f   : > { %v1021_v47 = vld [vmem:[%s1220_s11 + $0x70] ss:$8 sps:$4 sm:$0xff]   ;;  %v279_v51 = vld [vmem:[%s1433_s2] sm:$0x3]  ;;  %v287_v52 = vsub.s32 1, %v282_v49  ;;  %s800_s5 = sshll.u32 %s208_s29, 8 }
  0x20   : > { %540 = vmatpush1.bf16.msra.mxu0 %v964_v9  ;;  %881 = vmatpush1.bf16.msra.mxu1 %v964_v9  ;;  %v1304_v53 = vrot.slane %v279_v51, %v283_v50  ;;  %s1312_s11 = scalar_lea.vmem [#allocation2], %s800_s5  ;;  %s860_s6 = sshll.u32 %s1092_s15, 12 }
  0x21   : > { %541 = vmatprep.subr.bf16.mxu0 %v965_v10  ;;  %866 = vmatprep.subr.bf16.mxu1 %v965_v10  ;;  %v1306_v54 = vrot.slane %v279_v51, %v287_v52  ;;  %s693_s7 = sshll.u32 %s1312_s11, 4  ;;  %s1371_s10 = scalar_lea.hbm %s1434_s3, %s860_s6  ;;  %s1373_s7 = int_to_ptr.vmem [resolvable:$true] %s693_s7 }
  0x22   : > { %s1385_s18 = scalar_lea.sflag [#allocation3], %s208_s29  ;;  %s1022_s19 = scalar_lea.vmem %s1373_s7, 4096 }
  0x23   : > { %p1023_p12 = scmp.ne.s32.totalorder %s1373_s7, %s1022_s19  ;;  %s1102_s9 = smov [#allocation2]  }
  0x24   : > { %542 = vmatpush1.bf16.msra.mxu0 %v967_v11  ;;  %882 = vmatpush1.bf16.msra.mxu1 %v967_v11  ;;  %s1026_s21 = sshll.u32 %s1102_s9, 4  ;;  %s1027_s21 = int_to_ptr.vmem [resolvable:$false] %s1026_s21 }
  0x25   : > { %543 = vmatprep.subr.bf16.mxu0 %v968_v12  ;;  %867 = vmatprep.subr.bf16.mxu1 %v968_v12  ;;  %p1024_p13 = pnand %p1023_p12, %p1165_p4  ;;  %s1028_s23 = scalar_lea.vmem %s1027_s21, 8192 }
  0x26   : > { %p1029_p1 = scmp.lt.s32.totalorder %s1373_s7, %s1027_s21  ;;  %p1030_p2 = scmp.lt.s32.totalorder %s1028_s23, %s1022_s19 }
  0x27   : > { %p1025_p0 = pneg %p1024_p13 }
  0x28   : > { %544 = vmatpush1.bf16.msra.mxu0 %v970_v14  ;;  %883 = vmatpush1.bf16.msra.mxu1 %v970_v14  ;;  %p1031_p3 = por %p1030_p2, %p1029_p1 }
  0x29   : > { %545 = vmatprep.subr.bf16.mxu0 %v971_v16  ;;  %868 = vmatprep.subr.bf16.mxu1 %v971_v16 }
  0x2a   : > { %p1032_p5 = pnand %p1031_p3, %p1025_p0 }
  0x2c   : > { %546 = vmatpush1.bf16.msra.mxu0 %v973_v17  ;;  %884 = vmatpush1.bf16.msra.mxu1 %v973_v17 }
  0x2d   : > { %547 = vmatprep.subr.bf16.mxu0 %v974_v18  ;;  %869 = vmatprep.subr.bf16.mxu1 %v974_v18 }
  0x30   : > { %548 = vmatpush1.bf16.msra.mxu0 %v976_v19  ;;  %885 = vmatpush1.bf16.msra.mxu1 %v976_v19 }
  0x31   : > { %549 = vmatprep.subr.bf16.mxu0 %v977_v20  ;;  %870 = vmatprep.subr.bf16.mxu1 %v977_v20 }
  0x34   : > { %550 = vmatpush1.bf16.msra.mxu0 %v979_v21  ;;  %886 = vmatpush1.bf16.msra.mxu1 %v979_v21 }
  0x35   : > { %551 = vmatprep.subr.bf16.mxu0 %v980_v22  ;;  %871 = vmatprep.subr.bf16.mxu1 %v980_v22 }
  0x38   : > { %552 = vmatpush1.bf16.msra.mxu0 %v982_v23  ;;  %887 = vmatpush1.bf16.msra.mxu1 %v982_v23 }
  0x39   : > { %553 = vmatprep.subr.bf16.mxu0 %v983_v24  ;;  %872 = vmatprep.subr.bf16.mxu1 %v983_v24 }
  0x3c   : > { %554 = vmatpush1.bf16.msra.mxu0 %v985_v25  ;;  %888 = vmatpush1.bf16.msra.mxu1 %v985_v25 }
  0x3d   : > { %555 = vmatprep.subr.bf16.mxu0 %v986_v26  ;;  %873 = vmatprep.subr.bf16.mxu1 %v986_v26 }
  0x40   : > { %556 = vmatpush1.bf16.msra.mxu0 %v988_v27  ;;  %889 = vmatpush1.bf16.msra.mxu1 %v988_v27 }
  0x41   : > { %557 = vmatprep.subr.bf16.mxu0 %v989_v28  ;;  %874 = vmatprep.subr.bf16.mxu1 %v989_v28 }
  0x44   : > { %558 = vmatpush1.bf16.msra.mxu0 %v991_v29  ;;  %890 = vmatpush1.bf16.msra.mxu1 %v991_v29 }
  0x45   : > { %559 = vmatprep.subr.bf16.mxu0 %v992_v30  ;;  %875 = vmatprep.subr.bf16.mxu1 %v992_v30 }
  0x48   : > { %560 = vmatpush1.bf16.msra.mxu0 %v994_v31  ;;  %891 = vmatpush1.bf16.msra.mxu1 %v994_v31 }
  0x49   : > { %561 = vmatprep.subr.bf16.mxu0 %v995_v32  ;;  %876 = vmatprep.subr.bf16.mxu1 %v995_v32 }
  0x4c   : > { %562 = vmatpush1.bf16.msra.mxu0 %v997_v33  ;;  %892 = vmatpush1.bf16.msra.mxu1 %v997_v33 }
  0x4f   : > { %564 = vmatmul.mubr.bf16.vlgmr.msra.gmra.mrb[0].mxu0 %v998_v34  ;;  %604 = vmatmul.mubr.bf16.vlgmr.msra.gmra.mrb[0].mxu1 %v1001_v35 }
  0x50   : > { %573 = vmatprep.mubr.bf16.mxu0 %v1004_v36  ;;  %613 = vmatprep.mubr.bf16.mxu1 %v1006_v37 }
  0x57   : > { %574 = vmatmul.mubr.bf16.gmra.mrb[4].mxu0 %v1008_v38  ;;  %614 = vmatmul.mubr.bf16.gmra.mrb[4].mxu1 %v1009_v39 }
  0x58   : > { %583 = vmatprep.mubr.bf16.mxu0 %v1010_v40  ;;  %623 = vmatprep.mubr.bf16.mxu1 %v1012_v41 }
  0x5f   : > { %584 = vmatmul.mubr.bf16.gmra.mrb[8].mxu0 %v1014_v42  ;;  %624 = vmatmul.mubr.bf16.gmra.mrb[8].mxu1 %v1015_v43 }
  0x60   : > { %593 = vmatprep.mubr.bf16.mxu0 %v1016_v44  ;;  %633 = vmatprep.mubr.bf16.mxu1 %v1018_v45 }
  0x67   : > { %594 = vmatmul.mubr.bf16.gmra.mrb[12].mxu0 %v1020_v46  ;;  %634 = vmatmul.mubr.bf16.gmra.mrb[12].mxu1 %v1021_v47 }
 0x122   : > { %v565_v55 = vpop.f32.mrb[0].mxu0  ;;  %v605_v56 = vpop.f32.mrb[0].mxu1 }
 0x123   : > { %v566_v57 = vadd.f32 %v565_v55, %v1304_v53  ;;  %v606_v58 = vadd.f32 %v605_v56, %v1304_v53  ;;  %v567_v59 = vpop.f32.mrb[1].mxu0  ;;  %v607_v60 = vpop.f32.mrb[1].mxu1 }
 0x124   : > { %v568_v61 = vadd.f32 %v567_v59, %v1306_v54  ;;  %v608_v62 = vadd.f32 %v607_v60, %v1306_v54  ;;  %v569_v63 = vpop.f32.mrb[2].mxu0  ;;  %v609_v0 = vpop.f32.mrb[2].mxu1 }
 0x125   : > { %644 = vst [vmem:[%s1312_s11] sm:$0xff] %v566_v57  ;;  %660 = vst [vmem:[%s1312_s11 + $0x80] sm:$0xff] %v606_v58  ;;  %v570_v1 = vadd.f32 %v569_v63, %v1304_v53  ;;  %v610_v2 = vadd.f32 %v609_v0, %v1304_v53  ;;  %v571_v3 = vpop.f32.mrb[3].mxu0  ;;  %v611_v4 = vpop.f32.mrb[3].mxu1 }
 0x126   : > { %645 = vst [vmem:[%s1312_s11 + $0x8] sm:$0xff] %v568_v61  ;;  %661 = vst [vmem:[%s1312_s11 + $0x88] sm:$0xff] %v608_v62  ;;  %v572_v5 = vadd.f32 %v571_v3, %v1306_v54  ;;  %v612_v6 = vadd.f32 %v611_v4, %v1306_v54 }
 0x127   : > { %646 = vst [vmem:[%s1312_s11 + $0x10] sm:$0xff] %v570_v1  ;;  %662 = vst [vmem:[%s1312_s11 + $0x90] sm:$0xff] %v610_v2 }
 0x128   : > { %647 = vst [vmem:[%s1312_s11 + $0x18] sm:$0xff] %v572_v5  ;;  %663 = vst [vmem:[%s1312_s11 + $0x98] sm:$0xff] %v612_v6 }
 0x12a   : > { %v575_v7 = vpop.f32.mrb[4].mxu0  ;;  %v615_v8 = vpop.f32.mrb[4].mxu1 }
 0x12b   : > { %v576_v9 = vadd.f32 %v575_v7, %v1304_v53  ;;  %v616_v10 = vadd.f32 %v615_v8, %v1304_v53  ;;  %v577_v11 = vpop.f32.mrb[5].mxu0  ;;  %v617_v12 = vpop.f32.mrb[5].mxu1 }
 0x12c   : > { %v578_v13 = vadd.f32 %v577_v11, %v1306_v54  ;;  %v618_v14 = vadd.f32 %v617_v12, %v1306_v54  ;;  %v579_v15 = vpop.f32.mrb[6].mxu0  ;;  %v619_v16 = vpop.f32.mrb[6].mxu1 }
 0x12d   : > { %648 = vst [vmem:[%s1312_s11 + $0x20] sm:$0xff] %v576_v9  ;;  %664 = vst [vmem:[%s1312_s11 + $0xa0] sm:$0xff] %v616_v10  ;;  %v580_v17 = vadd.f32 %v579_v15, %v1304_v53  ;;  %v620_v18 = vadd.f32 %v619_v16, %v1304_v53  ;;  %v581_v19 = vpop.f32.mrb[7].mxu0  ;;  %v621_v20 = vpop.f32.mrb[7].mxu1 }
 0x12e   : > { %649 = vst [vmem:[%s1312_s11 + $0x28] sm:$0xff] %v578_v13  ;;  %665 = vst [vmem:[%s1312_s11 + $0xa8] sm:$0xff] %v618_v14  ;;  %v582_v21 = vadd.f32 %v581_v19, %v1306_v54  ;;  %v622_v22 = vadd.f32 %v621_v20, %v1306_v54 }
 0x12f   : > { %650 = vst [vmem:[%s1312_s11 + $0x30] sm:$0xff] %v580_v17  ;;  %666 = vst [vmem:[%s1312_s11 + $0xb0] sm:$0xff] %v620_v18 }
 0x130   : > { %651 = vst [vmem:[%s1312_s11 + $0x38] sm:$0xff] %v582_v21  ;;  %667 = vst [vmem:[%s1312_s11 + $0xb8] sm:$0xff] %v622_v22 }
 0x132   : > { %v585_v23 = vpop.f32.mrb[8].mxu0  ;;  %v625_v24 = vpop.f32.mrb[8].mxu1 }
 0x133   : > { %v586_v25 = vadd.f32 %v585_v23, %v1304_v53  ;;  %v626_v26 = vadd.f32 %v625_v24, %v1304_v53  ;;  %v587_v27 = vpop.f32.mrb[9].mxu0  ;;  %v627_v28 = vpop.f32.mrb[9].mxu1 }
 0x134   : > { %v588_v29 = vadd.f32 %v587_v27, %v1306_v54  ;;  %v628_v30 = vadd.f32 %v627_v28, %v1306_v54  ;;  %v589_v31 = vpop.f32.mrb[10].mxu0  ;;  %v629_v32 = vpop.f32.mrb[10].mxu1 }
 0x135   : > { %652 = vst [vmem:[%s1312_s11 + $0x40] sm:$0xff] %v586_v25  ;;  %668 = vst [vmem:[%s1312_s11 + $0xc0] sm:$0xff] %v626_v26  ;;  %v590_v33 = vadd.f32 %v589_v31, %v1304_v53  ;;  %v630_v34 = vadd.f32 %v629_v32, %v1304_v53  ;;  %v591_v35 = vpop.f32.mrb[11].mxu0  ;;  %v631_v36 = vpop.f32.mrb[11].mxu1 }
 0x136   : > { %653 = vst [vmem:[%s1312_s11 + $0x48] sm:$0xff] %v588_v29  ;;  %669 = vst [vmem:[%s1312_s11 + $0xc8] sm:$0xff] %v628_v30  ;;  %v592_v37 = vadd.f32 %v591_v35, %v1306_v54  ;;  %v632_v38 = vadd.f32 %v631_v36, %v1306_v54 }
 0x137   : > { %654 = vst [vmem:[%s1312_s11 + $0x50] sm:$0xff] %v590_v33  ;;  %670 = vst [vmem:[%s1312_s11 + $0xd0] sm:$0xff] %v630_v34 }
 0x138   : > { %655 = vst [vmem:[%s1312_s11 + $0x58] sm:$0xff] %v592_v37  ;;  %671 = vst [vmem:[%s1312_s11 + $0xd8] sm:$0xff] %v632_v38 }
 0x13a   : > { %v595_v39 = vpop.f32.mrb[12].mxu0  ;;  %v635_v40 = vpop.f32.mrb[12].mxu1 }
 0x13b   : > { %v596_v41 = vadd.f32 %v595_v39, %v1304_v53  ;;  %v636_v42 = vadd.f32 %v635_v40, %v1304_v53  ;;  %v597_v43 = vpop.f32.mrb[13].mxu0  ;;  %v637_v44 = vpop.f32.mrb[13].mxu1 }
 0x13c   : > { %v598_v45 = vadd.f32 %v597_v43, %v1306_v54  ;;  %v638_v46 = vadd.f32 %v637_v44, %v1306_v54  ;;  %v599_v47 = vpop.f32.mrb[14].mxu0  ;;  %v639_v48 = vpop.f32.mrb[14].mxu1 }
 0x13d   : > { %656 = vst [vmem:[%s1312_s11 + $0x60] sm:$0xff] %v596_v41  ;;  %672 = vst [vmem:[%s1312_s11 + $0xe0] sm:$0xff] %v636_v42  ;;  %v600_v49 = vadd.f32 %v599_v47, %v1304_v53  ;;  %v640_v50 = vadd.f32 %v639_v48, %v1304_v53  ;;  %v601_v51 = vpop.f32.mrb[15].mxu0  ;;  %v641_v52 = vpop.f32.mrb[15].mxu1 }
 0x13e   : > { %657 = vst [vmem:[%s1312_s11 + $0x68] sm:$0xff] %v598_v45  ;;  %673 = vst [vmem:[%s1312_s11 + $0xe8] sm:$0xff] %v638_v46  ;;  %v602_v55 = vadd.f32 %v601_v51, %v1306_v54  ;;  %v642_v56 = vadd.f32 %v641_v52, %v1306_v54 }
 0x13f   : > { %658 = vst [vmem:[%s1312_s11 + $0x70] sm:$0xff] %v600_v49  ;;  %674 = vst [vmem:[%s1312_s11 + $0xf0] sm:$0xff] %v640_v50 }
 0x140   : > { %659 = vst [vmem:[%s1312_s11 + $0x78] sm:$0xff] %v602_v55  ;;  %675 = vst [vmem:[%s1312_s11 + $0xf8] sm:$0xff] %v642_v56 }
 0x141   : > { %1035 = shalt.err (!%p1032_p5)
}
 0x142   : > { %s1036_s26 = scalar_lea.hbm %s1371_s10, 4096  ;;  %s1040_s29 = scalar_lea.hbm %s1434_s3, 8192 }
 0x143   : > { %p1037_p6 = scmp.ne.s32.totalorder %s1371_s10, %s1036_s26  ;;  %p1041_p10 = scmp.lt.u32.totalorder %s1371_s10, %s1434_s3 }
 0x144   : > { %p1042_p11 = scmp.lt.u32.totalorder %s1040_s29, %s1036_s26  ;;  %p1044_p13 = scmp.lt.u32.totalorder %s1036_s26, %s1371_s10 }
 0x145   : > { %p1038_p7 = pnand %p1037_p6, %p1165_p4 }
 0x146   : > { %p1043_p12 = por %p1042_p11, %p1041_p10 }
 0x147   : > { %p1039_p9 = pneg %p1038_p7 }
 0x148   : > { %p1045_p0 = por %p1044_p13, %p1043_p12 }
 0x14a   : > { %p1046_p1 = pnand %p1045_p0, %p1039_p9 }
 0x14c   : > { %1049 = shalt.err (!%p1046_p1)
}
 0x14d   : > { %s1103_s5 = smov 256   ;;  %s1104_s11 = smov 16  }
 0x14e   : > { %893 = dma.vmem_to_hbm [thread:$0]  (%p1165_p4), %s1373_s7, 4096, %s1371_s10, %s1385_s18, %s1103_s5, %s1103_s5, %s1104_s11  }
 0x14f PF: > { %p899_p2 = scmp.ge.s32.totalorder %s1100_s17, 2  ;;  %s708_s6 = sand.u32 1, %s1080_s12  }
 0x150   : > { %s709_s15 = scalar_lea.sflag [#allocation3], %s708_s6 }
 0x151   : > { %p896_p3 = pnand %p899_p2, %p1172_p8 }
 0x153   : > { %1075 = dma.done.wait (!%p896_p3), %s709_s15, 4096  }
 0x154   : > { %1077 = vsyncadd (!%p896_p3), %s709_s15, 4294963200  ;;  %s16_s17 = sadd.s32 1, %s1100_s17   ;;  %s1437_s12 = smov %s1084_s13 }
 0x155   : > { %p13_p5 = scmp.ge.s32.totalorder %s16_s17, 4   ;;  %s1438_s13 = smov %s1088_s14 }
 0x156   : > { %s1439_s14 = smov %s1178_s25  ;;  %s1440_s15 = smov %s1096_s16 }
 0x157   : > { %s1441_s16 = smov %s1443_s20  ;;  %15 = sbr.rel (!%p13_p5) target bundleno = 4 (0x4), region = 73 }
 0x15e   :  { %714 = vsyncpa [#allocation3], 1 }
 0x15f   :  { %716 = vsyncpa [#allocation3 + $0x1], 1 }

// kernel: attention_pallas.4
= control target key start
LH: loop header
LB: loop body
LE: loop exit
PB: predicated region body
PF: predicated region fallthrough
CT: control target
= control target key end

     0   :  { %s3295_s0 = inlined_call_operand.vmem [shape: bf16[2,128,768], index: 0, kind: input, shape index: {}, may-alias: {0,1,2}]   ;;  %s3296_s1 = inlined_call_operand.vmem [shape: bf16[2,128,768], index: 1, kind: input, shape index: {}, may-alias: {0,1,2}]   ;;  %s3297_s2 = inlined_call_operand.vmem [shape: bf16[2,128,768], index: 2, kind: input, shape index: {}, may-alias: {0,1,2}]   ;;  %s3298_s3 = inlined_call_operand.vmem [shape: bf16[2,128,256], index: 3, kind: output, shape index: {}]  }
   0x1   :  { %3300 = sst [smem:[#allocation11_spill]] %s3298_s3 }
   0x2   :  { %s2597_s12 = smov 0   ;;  %s2599_s13 = smov 0  }
   0x3   :  { %s2601_s14 = smov 0   ;;  %s2603_s15 = smov 0  }
   0x4   :  { %s2605_s16 = smov 0   ;;  %s2607_s17 = smov 0  }
   0x5   :  { %s2609_s18 = smov 0   ;;  %s2611_s19 = smov 0  }
   0x6   :  { %s2613_s20 = smov 0   ;;  %s2615_s21 = smov 0  }
   0x7   :  { %s2617_s22 = smov 0  }
   0x8 LB: > { %s35_s24 = sadd.s32 1, %s2564_s20  ;;  %s39_s25 = sadd.s32 1, %s2568_s21  ;;  %s2572_s22 = sphi %s2617_s22, %s13_s22   ;;  %s2568_s21 = sphi %s2615_s21, %s3332_s21   ;;  %s2564_s20 = sphi %s2613_s20, %s3331_s20   ;;  %s2560_s19 = sphi %s2611_s19, %s3330_s19   ;;  %s2556_s18 = sphi %s2609_s18, %s3329_s18   ;;  %s2552_s17 = sphi %s2607_s17, %s3328_s17   ;;  %s2548_s16 = sphi %s2605_s16, %s3327_s16   ;;  %s2544_s15 = sphi %s2603_s15, %s3326_s15   ;;  %s2540_s14 = sphi %s2601_s14, %s3325_s14   ;;  %s2536_s13 = sphi %s2599_s13, %s3324_s13   ;;  %s2532_s12 = sphi %s2597_s12, %s3323_s12  }
   0x9   : > { %p37_p0 = scmp.ge.s32.totalorder %s35_s24, 2  ;;  %s50_s26 = sadd.s32 1, %s2552_s17 }
   0xa   : > { %p57_p1 = scmp.ne.s32.totalorder %s2552_s17, %s2548_s16  ;;  %p58_p2 = scmp.eq.s32.totalorder %s2572_s22, 0 }
   0xb   : > { %s3334_s24 = smov (%p37_p0, %s35_s24), 0  ;;  %s3336_s25 = smov (!%p37_p0, %s39_s25), %s2568_s21 }
   0xc   : > { %s46_s27 = ssub.s32 %s2564_s20, %s3334_s24  ;;  %p41_p3 = scmp.ge.s32.totalorder %s3336_s25, 2 }
   0xd   : > { %s73_s28 = sadd.s32 2, %s2564_s20  ;;  %p2670_p4 = por %p58_p2, %p57_p1 }
   0xe   : > { %s74_s30 = sadd.s32 2, %s3334_s24  ;;  %s3338_s25 = smov (%p41_p3, %s3336_s25), 0 }
   0xf   : > { %3302 = sst [smem:[#allocation10_spill]] %s3338_s25  ;;  %s78_s4 = ssub.s32 %s73_s28, %s74_s30 }
  0x10   : > { %s82_s5 = sadd.s32 1, %s2544_s15  ;;  %s43_s6 = ssub.s32 %s2568_s21, %s3338_s25 }
  0x11   : > { %p89_p5 = scmp.ne.s32.totalorder %s2544_s15, %s2540_s14  ;;  %s47_s7 = sor.u32 %s46_s27, %s43_s6 }
  0x12   : > { %s79_s8 = sor.u32 %s78_s4, %s43_s6  ;;  %p48_p6 = scmp.eq.s32.totalorder %s47_s7, 0 }
  0x13   : > { %p80_p7 = scmp.eq.s32.totalorder %s79_s8, 0  ;;  %p2684_p8 = por %p89_p5, %p58_p2 }
  0x14   : > { %s105_s10 = sadd.s32 4, %s2564_s20  ;;  %s106_s30 = sadd.s32 4, %s3334_s24 }
  0x15   : > { %s2690_s11 = scalar_select %p48_p6, %s2552_s17, %s50_s26  }
  0x16   : > { %s2693_s28 = scalar_select %p80_p7, %s2544_s15, %s82_s5  }
  0x17   : > { %s114_s23 = sadd.s32 1, %s2536_s13  ;;  %s110_s25 = ssub.s32 %s105_s10, %s106_s30 }
  0x18   : > { %p121_p9 = scmp.ne.s32.totalorder %s2536_s13, %s2532_s12  ;;  %s111_s27 = sor.u32 %s110_s25, %s43_s6 }
  0x19   : > { %s3304_s3 = sadd.s32 4294967295, %s2572_s22   ;;  %p112_p11 = scmp.eq.s32.totalorder %s111_s27, 0 }
  0x1a   : > { %p155_p10 = scmp.eq.s32.totalorder %s3304_s3, 3  ;;  %p2703_p12 = por %p121_p9, %p58_p2 }
  0x1b   : > { %s2715_s26 = scalar_select %p112_p11, %s2536_s13, %s114_s23  }
  0x1c   : > { %p2710_p13 = por %p155_p10, %p57_p1  ;;  %p2001_p0 = scmp.ge.s32.totalorder %s2572_s22, 4 }
  0x1e   : > { %177 = sbr.rel (%p2001_p0) target bundleno = 88 (0x58), region = 16 }
  0x25   : > { %180 = sbr.rel (!%p2670_p4) target bundleno = 54 (0x36), region = 20  ;;  %s182_s3 = sand.u32 (%p2670_p4), 1, %s2552_s17  }
  0x26   : > { %s2280_s25 = smul.u32 (%p2670_p4), 96, %s2568_s21  ;;  %s2002_s5 = sshll.u32 (%p2670_p4), %s182_s3, 6 }
  0x27   : > { %s184_s23 = scalar_lea.vmem (%p2670_p4), [#allocation6], %s2002_s5 }
  0x28   : > { %s189_s6 = sadd.s32 (%p2670_p4), %s2564_s20, %s2280_s25 }
  0x29   : > { %s2003_s8 = sshll.u32 (%p2670_p4), %s189_s6, 2 }
  0x2a   : > { %s2726_s27 = scalar_lea.vmem (%p2670_p4), %s3295_s0, %s2003_s8 }
  0x2b   : > { %v207_v0 = vld [vmem:[%s2726_s27] sm:$0xf] (%p2670_p4)  ;;  %v209_v1 = vld [vmem:[%s2726_s27 + $0x18] sm:$0xf] (%p2670_p4)  ;;  %v211_v2 = vld [vmem:[%s2726_s27 + $0x30] sm:$0xf] (%p2670_p4) }
  0x2c   : > { %208 = vst [vmem:[%s184_s23] sm:$0xf] %v207_v0  ;;  %210 = vst [vmem:[%s184_s23 + $0x4] sm:$0xf] %v209_v1  ;;  %v213_v3 = vld [vmem:[%s2726_s27 + $0x48] sm:$0xf] }
  0x2d   : > { %212 = vst [vmem:[%s184_s23 + $0x8] sm:$0xf] %v211_v2  ;;  %v215_v4 = vld [vmem:[%s2726_s27 + $0x60] sm:$0xf]  ;;  %v217_v5 = vld [vmem:[%s2726_s27 + $0x78] sm:$0xf] }
  0x2e   : > { %214 = vst [vmem:[%s184_s23 + $0xc] sm:$0xf] %v213_v3  ;;  %216 = vst [vmem:[%s184_s23 + $0x10] sm:$0xf] %v215_v4  ;;  %v219_v6 = vld [vmem:[%s2726_s27 + $0x90] sm:$0xf] }
  0x2f   : > { %218 = vst [vmem:[%s184_s23 + $0x14] sm:$0xf] %v217_v5  ;;  %v221_v7 = vld [vmem:[%s2726_s27 + $0xa8] sm:$0xf]  ;;  %v223_v8 = vld [vmem:[%s2726_s27 + $0xc0] sm:$0xf] }
  0x30   : > { %220 = vst [vmem:[%s184_s23 + $0x18] sm:$0xf] %v219_v6  ;;  %222 = vst [vmem:[%s184_s23 + $0x1c] sm:$0xf] %v221_v7  ;;  %v225_v9 = vld [vmem:[%s2726_s27 + $0xd8] sm:$0xf] }
  0x31   : > { %224 = vst [vmem:[%s184_s23 + $0x20] sm:$0xf] %v223_v8  ;;  %v227_v10 = vld [vmem:[%s2726_s27 + $0xf0] sm:$0xf]  ;;  %v229_v11 = vld [vmem:[%s2726_s27 + $0x108] sm:$0xf] }
  0x32   : > { %226 = vst [vmem:[%s184_s23 + $0x24] sm:$0xf] %v225_v9  ;;  %228 = vst [vmem:[%s184_s23 + $0x28] sm:$0xf] %v227_v10  ;;  %v231_v12 = vld [vmem:[%s2726_s27 + $0x120] sm:$0xf] }
  0x33   : > { %230 = vst [vmem:[%s184_s23 + $0x2c] sm:$0xf] %v229_v11  ;;  %v233_v13 = vld [vmem:[%s2726_s27 + $0x138] sm:$0xf]  ;;  %v235_v14 = vld [vmem:[%s2726_s27 + $0x150] sm:$0xf] }
  0x34   : > { %232 = vst [vmem:[%s184_s23 + $0x30] sm:$0xf] %v231_v12  ;;  %234 = vst [vmem:[%s184_s23 + $0x34] sm:$0xf] %v233_v13  ;;  %v237_v15 = vld [vmem:[%s2726_s27 + $0x168] sm:$0xf] }
  0x35   : > { %236 = vst [vmem:[%s184_s23 + $0x38] sm:$0xf] %v235_v14  ;;  %238 = vst [vmem:[%s184_s23 + $0x3c] sm:$0xf] %v237_v15 }
  0x36 PF: > { %293 = sbr.rel (!%p2684_p8) target bundleno = 71 (0x47), region = 61  ;;  %s295_s29 = sand.u32 (%p2684_p8), 1, %s2544_s15  }
  0x37   : > { %s1894_s3 = smul.u32 (%p2684_p8), 96, %s2568_s21  ;;  %s2004_s25 = sshll.u32 (%p2684_p8), %s295_s29, 6 }
  0x38   : > { %s297_s9 = scalar_lea.vmem (%p2684_p8), [#allocation7], %s2004_s25 }
  0x39   : > { %s1895_s5 = sadd.s32 (%p2684_p8), %s2564_s20, %s1894_s3 }
  0x3a   : > { %s2005_s6 = sshll.u32 (%p2684_p8), %s1895_s5, 2 }
  0x3b   : > { %s2752_s30 = scalar_lea.vmem (%p2684_p8), %s3296_s1, %s2005_s6 }
  0x3c   : > { %v2006_v16 = vld [vmem:[%s2752_s30 + $0x8] sm:$0xf] (%p2684_p8)  ;;  %v2007_v17 = vld [vmem:[%s2752_s30 + $0x20] sm:$0xf] (%p2684_p8)  ;;  %v2008_v18 = vld [vmem:[%s2752_s30 + $0x38] sm:$0xf] (%p2684_p8) }
  0x3d   : > { %322 = vst [vmem:[%s297_s9] sm:$0xf] %v2006_v16  ;;  %324 = vst [vmem:[%s297_s9 + $0x4] sm:$0xf] %v2007_v17  ;;  %v2009_v19 = vld [vmem:[%s2752_s30 + $0x50] sm:$0xf] }
  0x3e   : > { %326 = vst [vmem:[%s297_s9 + $0x8] sm:$0xf] %v2008_v18  ;;  %v2010_v20 = vld [vmem:[%s2752_s30 + $0x68] sm:$0xf]  ;;  %v2011_v21 = vld [vmem:[%s2752_s30 + $0x80] sm:$0xf] }
  0x3f   : > { %328 = vst [vmem:[%s297_s9 + $0xc] sm:$0xf] %v2009_v19  ;;  %330 = vst [vmem:[%s297_s9 + $0x10] sm:$0xf] %v2010_v20  ;;  %v2012_v22 = vld [vmem:[%s2752_s30 + $0x98] sm:$0xf] }
  0x40   : > { %332 = vst [vmem:[%s297_s9 + $0x14] sm:$0xf] %v2011_v21  ;;  %v2013_v23 = vld [vmem:[%s2752_s30 + $0xb0] sm:$0xf]  ;;  %v2014_v24 = vld [vmem:[%s2752_s30 + $0xc8] sm:$0xf] }
  0x41   : > { %334 = vst [vmem:[%s297_s9 + $0x18] sm:$0xf] %v2012_v22  ;;  %336 = vst [vmem:[%s297_s9 + $0x1c] sm:$0xf] %v2013_v23  ;;  %v2015_v25 = vld [vmem:[%s2752_s30 + $0xe0] sm:$0xf] }
  0x42   : > { %338 = vst [vmem:[%s297_s9 + $0x20] sm:$0xf] %v2014_v24  ;;  %v2016_v26 = vld [vmem:[%s2752_s30 + $0xf8] sm:$0xf]  ;;  %v2017_v27 = vld [vmem:[%s2752_s30 + $0x110] sm:$0xf] }
  0x43   : > { %340 = vst [vmem:[%s297_s9 + $0x24] sm:$0xf] %v2015_v25  ;;  %342 = vst [vmem:[%s297_s9 + $0x28] sm:$0xf] %v2016_v26  ;;  %v2018_v28 = vld [vmem:[%s2752_s30 + $0x128] sm:$0xf] }
  0x44   : > { %344 = vst [vmem:[%s297_s9 + $0x2c] sm:$0xf] %v2017_v27  ;;  %v2019_v29 = vld [vmem:[%s2752_s30 + $0x140] sm:$0xf]  ;;  %v2020_v30 = vld [vmem:[%s2752_s30 + $0x158] sm:$0xf] }
  0x45   : > { %346 = vst [vmem:[%s297_s9 + $0x30] sm:$0xf] %v2018_v28  ;;  %348 = vst [vmem:[%s297_s9 + $0x34] sm:$0xf] %v2019_v29  ;;  %v2021_v31 = vld [vmem:[%s2752_s30 + $0x170] sm:$0xf] }
  0x46   : > { %350 = vst [vmem:[%s297_s9 + $0x38] sm:$0xf] %v2020_v30  ;;  %352 = vst [vmem:[%s297_s9 + $0x3c] sm:$0xf] %v2021_v31 }
  0x47 PF: > { %407 = sbr.rel (!%p2703_p12) target bundleno = 88 (0x58), region = 102  ;;  %s409_s27 = sand.u32 (%p2703_p12), 1, %s2536_s13  }
  0x48   : > { %s1903_s23 = smul.u32 (%p2703_p12), 96, %s2568_s21  ;;  %s2022_s29 = sshll.u32 (%p2703_p12), %s409_s27, 6 }
  0x49   : > { %s411_s4 = scalar_lea.vmem (%p2703_p12), [#allocation8], %s2022_s29 }
  0x4a   : > { %s1904_s3 = sadd.s32 (%p2703_p12), %s2564_s20, %s1903_s23 }
  0x4b   : > { %s2023_s25 = sshll.u32 (%p2703_p12), %s1904_s3, 2 }
  0x4c   : > { %s2778_s8 = scalar_lea.vmem (%p2703_p12), %s3297_s2, %s2023_s25 }
  0x4d   : > { %v2024_v32 = vld [vmem:[%s2778_s8 + $0x10] sm:$0xf] (%p2703_p12)  ;;  %v2025_v33 = vld [vmem:[%s2778_s8 + $0x28] sm:$0xf] (%p2703_p12)  ;;  %v2026_v34 = vld [vmem:[%s2778_s8 + $0x40] sm:$0xf] (%p2703_p12) }
  0x4e   : > { %436 = vst [vmem:[%s411_s4] sm:$0xf] %v2024_v32  ;;  %438 = vst [vmem:[%s411_s4 + $0x4] sm:$0xf] %v2025_v33  ;;  %v2027_v35 = vld [vmem:[%s2778_s8 + $0x58] sm:$0xf] }
  0x4f   : > { %440 = vst [vmem:[%s411_s4 + $0x8] sm:$0xf] %v2026_v34  ;;  %v2028_v36 = vld [vmem:[%s2778_s8 + $0x70] sm:$0xf]  ;;  %v2029_v37 = vld [vmem:[%s2778_s8 + $0x88] sm:$0xf] }
  0x50   : > { %442 = vst [vmem:[%s411_s4 + $0xc] sm:$0xf] %v2027_v35  ;;  %444 = vst [vmem:[%s411_s4 + $0x10] sm:$0xf] %v2028_v36  ;;  %v2030_v38 = vld [vmem:[%s2778_s8 + $0xa0] sm:$0xf] }
  0x51   : > { %446 = vst [vmem:[%s411_s4 + $0x14] sm:$0xf] %v2029_v37  ;;  %v2031_v39 = vld [vmem:[%s2778_s8 + $0xb8] sm:$0xf]  ;;  %v2032_v40 = vld [vmem:[%s2778_s8 + $0xd0] sm:$0xf] }
  0x52   : > { %448 = vst [vmem:[%s411_s4 + $0x18] sm:$0xf] %v2030_v38  ;;  %450 = vst [vmem:[%s411_s4 + $0x1c] sm:$0xf] %v2031_v39  ;;  %v2033_v41 = vld [vmem:[%s2778_s8 + $0xe8] sm:$0xf] }
  0x53   : > { %452 = vst [vmem:[%s411_s4 + $0x20] sm:$0xf] %v2032_v40  ;;  %v2034_v42 = vld [vmem:[%s2778_s8 + $0x100] sm:$0xf]  ;;  %v2035_v43 = vld [vmem:[%s2778_s8 + $0x118] sm:$0xf] }
  0x54   : > { %454 = vst [vmem:[%s411_s4 + $0x24] sm:$0xf] %v2033_v41  ;;  %456 = vst [vmem:[%s411_s4 + $0x28] sm:$0xf] %v2034_v42  ;;  %v2036_v44 = vld [vmem:[%s2778_s8 + $0x130] sm:$0xf] }
  0x55   : > { %458 = vst [vmem:[%s411_s4 + $0x2c] sm:$0xf] %v2035_v43  ;;  %v2037_v45 = vld [vmem:[%s2778_s8 + $0x148] sm:$0xf]  ;;  %v2038_v46 = vld [vmem:[%s2778_s8 + $0x160] sm:$0xf] }
  0x56   : > { %460 = vst [vmem:[%s411_s4 + $0x30] sm:$0xf] %v2036_v44  ;;  %462 = vst [vmem:[%s411_s4 + $0x34] sm:$0xf] %v2037_v45  ;;  %v2039_v47 = vld [vmem:[%s2778_s8 + $0x178] sm:$0xf] }
  0x57   : > { %464 = vst [vmem:[%s411_s4 + $0x38] sm:$0xf] %v2038_v46  ;;  %466 = vst [vmem:[%s411_s4 + $0x3c] sm:$0xf] %v2039_v47 }
  0x58 PF: > { %p2040_p1 = scmp.ge.s32.totalorder %s2572_s22, 1  ;;  %p520_p2 = scmp.lt.s32.totalorder %s2572_s22, 5 }
  0x5a   : > { %p521_p3 = pnand %p2040_p1, %p520_p2 }
  0x5b   : > { %s534_s10 = sand.u32 (!%p521_p3), 1, %s2540_s14   ;;  %s527_s9 = sand.u32 (!%p521_p3), 1, %s2548_s16   ;;  %vm646_vm0 = vcmask (!%p521_p3), 7168   ;;  %v2574_v40 = vmov (!%p521_p3), -1e+30  }
  0x5c   : > { %524 = sbr.rel (%p521_p3) target bundleno = 1012 (0x3f4), region = 143  ;;  %s2042_s30 = sshll.u32 (!%p521_p3), %s534_s10, 6  ;;  %649 = vst.msk [vmem:[#allocation3 + $0x10] sm:$0xff] (!%p521_p3), %vm646_vm0, %v2574_v40  ;;  %647 = vst.msk [vmem:[#allocation3] sm:$0xff] (!%p521_p3), %vm646_vm0, %v2574_v40 }
  0x5d   : > { %s536_s27 = scalar_lea.vmem (!%p521_p3), [#allocation7], %s2042_s30  ;;  %s2800_s23 = sshll.u32 (!%p521_p3), %s527_s9, 6  ;;  %648 = vst.msk [vmem:[#allocation3 + $0x8] sm:$0xff] (!%p521_p3), %vm646_vm0, %v2574_v40  ;;  %650 = vst.msk [vmem:[#allocation3 + $0x18] sm:$0xff] (!%p521_p3), %vm646_vm0, %v2574_v40 }
  0x5e   : > { %v2374_v48 = vld [vmem:[%s536_s27] sm:$0xff] (!%p521_p3)   ;;  %v2375_v49 = vld [vmem:[%s536_s27 + $0x8] sm:$0xff] (!%p521_p3)   ;;  %v2376_v50 = vld [vmem:[%s536_s27 + $0x10] sm:$0xff] (!%p521_p3)   ;;  %s2803_s29 = scalar_lea.vmem (!%p521_p3), [#allocation6], %s2800_s23  ;;  %651 = vst.msk [vmem:[#allocation3 + $0x20] sm:$0xff] (!%p521_p3), %vm646_vm0, %v2574_v40  ;;  %s541_s14 = sand.u32 (!%p521_p3), 1, %s2532_s12  }
  0x5f   : > { %2216 = vmatprep.subr.bf16.mxu0 (!%p521_p3), %v2374_v48  ;;  %v2099_v51 = vld [vmem:[%s2803_s29] sm:$0xff] (!%p521_p3)   ;;  %v2377_v57 = vld [vmem:[%s536_s27 + $0x18] sm:$0xff] (!%p521_p3)   ;;  %v2379_v59 = vld [vmem:[%s536_s27 + $0x28] sm:$0xff] (!%p521_p3)   ;;  %652 = vst.msk [vmem:[#allocation3 + $0x28] sm:$0xff] (!%p521_p3), %vm646_vm0, %v2574_v40  ;;  %s2043_s16 = sshll.u32 (!%p521_p3), %s541_s14, 6  ;;  %s3217_s12 = scalar_lea.vmem (!%p521_p3), [#allocation9], %s2800_s23 }
  0x60   : > { %2217 = vmatpush3.bf16.xpose.msra.mxu0 (!%p521_p3), %v2374_v48  ;;  %v2100_v52 = vunpack.c.l.bf16 (!%p521_p3), %v2099_v51  ;;  %v2101_v53 = vunpack.c.h.bf16 (!%p521_p3), %v2099_v51  ;;  %v2378_v58 = vld [vmem:[%s536_s27 + $0x20] sm:$0xff] (!%p521_p3)   ;;  %v2380_v60 = vld [vmem:[%s536_s27 + $0x30] sm:$0xff] (!%p521_p3)   ;;  %v2381_v61 = vld [vmem:[%s536_s27 + $0x38] sm:$0xff] (!%p521_p3)   ;;  %653 = vst.msk [vmem:[#allocation3 + $0x30] sm:$0xff] (!%p521_p3), %vm646_vm0, %v2574_v40  ;;  %s2894_s3 = scalar_lea.vmem (!%p521_p3), [#allocation8], %s2043_s16 }
  0x61   : > { %2218 = vmatprep.subr.bf16.mxu0 (!%p521_p3), %v2375_v49  ;;  %v2170_v62 = vld [vmem:[%s2803_s29 + $0x8] sm:$0xff] (!%p521_p3)   ;;  %v2171_v63 = vld [vmem:[%s2803_s29 + $0x10] sm:$0xff] (!%p521_p3)   ;;  %v2172_v8 = vld [vmem:[%s2803_s29 + $0x18] sm:$0xff] (!%p521_p3)   ;;  %654 = vst.msk [vmem:[#allocation3 + $0x38] sm:$0xff] (!%p521_p3), %vm646_vm0, %v2574_v40 }
  0x62   : > { %v614_v54 = vmul.f32 (!%p521_p3), 0.088388346, %v2100_v52  ;;  %v615_v55 = vmul.f32 (!%p521_p3), 0.088388346, %v2101_v53  ;;  %v2104_v0 = vunpack.c.l.bf16 (!%p521_p3), %v2170_v62  ;;  %v2105_v1 = vunpack.c.h.bf16 (!%p521_p3), %v2170_v62  ;;  %v2173_v9 = vld [vmem:[%s2803_s29 + $0x20] sm:$0xff] (!%p521_p3)   ;;  %v2174_v20 = vld [vmem:[%s2803_s29 + $0x28] sm:$0xff] (!%p521_p3)  }
  0x63   : > { %v2108_v2 = vunpack.c.l.bf16 %v2171_v63  ;;  %v2109_v3 = vunpack.c.h.bf16 %v2171_v63  ;;  %v2112_v11 = vunpack.c.l.bf16 %v2172_v8  ;;  %v2113_v12 = vunpack.c.h.bf16 %v2172_v8  ;;  %v2175_v21 = vld [vmem:[%s2803_s29 + $0x30] sm:$0xff]   ;;  %v2176_v32 = vld [vmem:[%s2803_s29 + $0x38] sm:$0xff]   ;;  %655 = vst.msk [vmem:[#allocation3 + $0x40] sm:$0xff] %vm646_vm0, %v2574_v40  ;;  %656 = vst.msk [vmem:[#allocation3 + $0x48] sm:$0xff] %vm646_vm0, %v2574_v40  ;;  %s2078_s25 = sshll.u32 (%p2710_p13), %s2560_s19, 5  ;;  %s3321_s4 = sld [smem:[#allocation11_spill]] (%p2710_p13) }
  0x64   : > { %v630_v56 = vpack.c.bf16 %v615_v55, %v614_v54  ;;  %v616_v4 = vmul.f32 0.088388346, %v2104_v0  ;;  %v617_v5 = vmul.f32 0.088388346, %v2105_v1  ;;  %v2116_v14 = vunpack.c.l.bf16 %v2173_v9  ;;  %657 = vst.msk [vmem:[#allocation3 + $0x50] sm:$0xff] %vm646_vm0, %v2574_v40  ;;  %658 = vst.msk [vmem:[#allocation3 + $0x58] sm:$0xff] %vm646_vm0, %v2574_v40  ;;  %s1768_s5 = sadd.s32 (%p2710_p13), %s2556_s18, %s2078_s25 }
  0x65   : > { %v618_v6 = vmul.f32 0.088388346, %v2108_v2  ;;  %v619_v7 = vmul.f32 0.088388346, %v2109_v3  ;;  %v2117_v15 = vunpack.c.h.bf16 %v2173_v9  ;;  %v620_v16 = vmul.f32 0.088388346, %v2112_v11 }
  0x66   : > { %2232 = vmatprep.mubr.bf16.mxu0 %v630_v56  ;;  %v631_v10 = vpack.c.bf16 %v617_v5, %v616_v4  ;;  %v621_v17 = vmul.f32 0.088388346, %v2113_v12  ;;  %v622_v18 = vmul.f32 0.088388346, %v2116_v14  ;;  %v2120_v23 = vunpack.c.l.bf16 %v2174_v20  ;;  %659 = vst.msk [vmem:[#allocation3 + $0x60] sm:$0xff] %vm646_vm0, %v2574_v40  ;;  %660 = vst.msk [vmem:[#allocation3 + $0x68] sm:$0xff] %vm646_vm0, %v2574_v40 }
  0x67   : > { %v632_v13 = vpack.c.bf16 %v619_v7, %v618_v6  ;;  %v623_v19 = vmul.f32 0.088388346, %v2117_v15  ;;  %v2121_v24 = vunpack.c.h.bf16 %v2174_v20  ;;  %v2124_v26 = vunpack.c.l.bf16 %v2175_v21  ;;  %661 = vst.msk [vmem:[#allocation3 + $0x70] sm:$0xff] %vm646_vm0, %v2574_v40  ;;  %662 = vst.msk [vmem:[#allocation3 + $0x78] sm:$0xff] %vm646_vm0, %v2574_v40  ;;  %v2900_v62 = vld [vmem:[#allocation3] sm:$0xff]  ;;  %v2908_v3 = vld [vmem:[#allocation3 + $0x18] sm:$0xff] }
  0x68   : > { %2219 = vmatpush3.bf16.xpose.msra.mxu0 %v2375_v49  ;;  %v633_v22 = vpack.c.bf16 %v621_v17, %v620_v16  ;;  %v2125_v27 = vunpack.c.h.bf16 %v2175_v21  ;;  %v624_v28 = vmul.f32 0.088388346, %v2120_v23  ;;  %v2128_v34 = vunpack.c.l.bf16 %v2176_v32  ;;  %v2915_v5 = vld [vmem:[#allocation3 + $0x8] sm:$0xff]  ;;  %v2384_v6 = vld [vmem:[%s2894_s3 + $0x10] sm:$0xff]   ;;  %v2385_v14 = vld [vmem:[%s2894_s3 + $0x18] sm:$0xff]   ;;  %s2079_s7 = sshll.u32 (%p2710_p13), %s1768_s5, 2 }
  0x69   : > { %2220 = vmatprep.subr.bf16.mxu0 %v2376_v50  ;;  %v634_v25 = vpack.c.bf16 %v623_v19, %v622_v18  ;;  %v625_v29 = vmul.f32 0.088388346, %v2121_v24  ;;  %v626_v30 = vmul.f32 0.088388346, %v2124_v26  ;;  %v2129_v35 = vunpack.c.h.bf16 %v2176_v32  ;;  %v2941_v16 = vld [vmem:[#allocation3 + $0x38] sm:$0xff]  ;;  %v2950_v21 = vld [vmem:[#allocation3 + $0x30] sm:$0xff]  ;;  %s1770_s10 = scalar_lea.vmem (%p2710_p13), %s3321_s4, %s2079_s7 }
  0x6a   : > { %v627_v31 = vmul.f32 0.088388346, %v2125_v27  ;;  %v628_v37 = vmul.f32 0.088388346, %v2128_v34  ;;  %v2576_v55 = vmov 0.0   ;;  %v2957_v24 = vld [vmem:[#allocation3 + $0x28] sm:$0xff] }
  0x6b   : > { %v635_v33 = vpack.c.bf16 %v625_v29, %v624_v28  ;;  %v629_v38 = vmul.f32 0.088388346, %v2129_v35  ;;  %665 = vst.msk [vmem:[#allocation4 + $0x10] sm:$0xff] %vm646_vm0, %v2576_v55  ;;  %663 = vst.msk [vmem:[#allocation4] sm:$0xff] %vm646_vm0, %v2576_v55  ;;  %v2388_v40 = vld [vmem:[%s2894_s3 + $0x30] sm:$0xff]  }
  0x6c   : > { %v636_v36 = vpack.c.bf16 %v627_v31, %v626_v30  ;;  %664 = vst.msk [vmem:[#allocation4 + $0x8] sm:$0xff] %vm646_vm0, %v2576_v55  ;;  %666 = vst.msk [vmem:[#allocation4 + $0x18] sm:$0xff] %vm646_vm0, %v2576_v55  ;;  %v2969_v30 = vld [vmem:[#allocation3 + $0x40] sm:$0xff]  ;;  %v2387_v31 = vld [vmem:[%s2894_s3 + $0x28] sm:$0xff]  }
  0x6d   : > { %v637_v39 = vpack.c.bf16 %v629_v38, %v628_v37  ;;  %667 = vst.msk [vmem:[#allocation4 + $0x20] sm:$0xff] %vm646_vm0, %v2576_v55  ;;  %668 = vst.msk [vmem:[#allocation4 + $0x28] sm:$0xff] %vm646_vm0, %v2576_v55 }
  0x6e   : > { %669 = vst.msk [vmem:[#allocation4 + $0x30] sm:$0xff] %vm646_vm0, %v2576_v55  ;;  %670 = vst.msk [vmem:[#allocation4 + $0x38] sm:$0xff] %vm646_vm0, %v2576_v55 }
  0x6f   : > { %671 = vst.msk [vmem:[#allocation4 + $0x40] sm:$0xff] %vm646_vm0, %v2576_v55  ;;  %672 = vst.msk [vmem:[#allocation4 + $0x48] sm:$0xff] %vm646_vm0, %v2576_v55 }
  0x70   : > { %2221 = vmatpush3.bf16.xpose.msra.mxu0 %v2376_v50  ;;  %v2575_v50 = vmov 0   ;;  %673 = vst.msk [vmem:[#allocation4 + $0x50] sm:$0xff] %vm646_vm0, %v2576_v55  ;;  %674 = vst.msk [vmem:[#allocation4 + $0x58] sm:$0xff] %vm646_vm0, %v2576_v55 }
  0x71   : > { %2222 = vmatprep.subr.bf16.mxu0 %v2377_v57  ;;  %2373 = vset.pattern.permute.xlu1 %v2575_v50  ;;  %675 = vst.msk [vmem:[#allocation4 + $0x60] sm:$0xff] %vm646_vm0, %v2576_v55  ;;  %676 = vst.msk [vmem:[#allocation4 + $0x68] sm:$0xff] %vm646_vm0, %v2576_v55 }
  0x72   : > { %2372 = vset.pattern.permute.xlu0 %v2575_v50  ;;  %677 = vst.msk [vmem:[#allocation4 + $0x70] sm:$0xff] %vm646_vm0, %v2576_v55  ;;  %678 = vst.msk [vmem:[#allocation4 + $0x78] sm:$0xff] %vm646_vm0, %v2576_v55  ;;  %v2997_v55 = vld [vmem:[#allocation3 + $0x48] sm:$0xff] }
  0x78   : > { %2223 = vmatpush3.bf16.xpose.msra.mxu0 %v2377_v57 }
  0x79   : > { %2224 = vmatprep.subr.bf16.mxu0 %v2378_v58 }
  0x80   : > { %2225 = vmatpush3.bf16.xpose.msra.mxu0 %v2378_v58 }
  0x81   : > { %2226 = vmatprep.subr.bf16.mxu0 %v2379_v59 }
  0x88   : > { %2227 = vmatpush3.bf16.xpose.msra.mxu0 %v2379_v59  ;;  %v2382_v59 = vld [vmem:[%s2894_s3] sm:$0xff]  }
  0x89   : > { %2228 = vmatprep.subr.bf16.mxu0 %v2380_v60  ;;  %2248 = vmatprep.subr.bf16.mxu1 %v2382_v59 }
  0x8a   : > { %2249 = vmatpush3.bf16.msra.mxu1 %v2382_v59 }
  0x90   : > { %2229 = vmatpush3.bf16.xpose.msra.mxu0 %v2380_v60  ;;  %v2383_v60 = vld [vmem:[%s2894_s3 + $0x8] sm:$0xff]  }
  0x91   : > { %2230 = vmatprep.subr.bf16.mxu0 %v2381_v61  ;;  %2250 = vmatprep.subr.bf16.mxu1 %v2383_v60 }
  0x92   : > { %2251 = vmatpush3.bf16.msra.mxu1 %v2383_v60 }
  0x93   : > { %2252 = vmatprep.subr.bf16.mxu1 %v2384_v6 }
  0x96   : > { %2253 = vmatpush3.bf16.msra.mxu1 %v2384_v6 }
  0x97   : > { %2254 = vmatprep.subr.bf16.mxu1 %v2385_v14 }
  0x98   : > { %2231 = vmatpush3.bf16.xpose.msra.mxu0 %v2381_v61  ;;  %v2898_v61 = vld [vmem:[#allocation3 + $0x10] sm:$0xff] }
  0x9a   : > { %2255 = vmatpush3.bf16.msra.mxu1 %v2385_v14 }
  0x9f   : > { %2233 = vmatmul.mubr.bf16.vlgmr.msra.gmra.mrb[0].mxu0 %v631_v10 }
  0xa0   : > { %2236 = vmatprep.mubr.bf16.mxu0 %v632_v13  ;;  %v2934_v13 = vld [vmem:[#allocation3 + $0x20] sm:$0xff] }
  0xa7   : > { %2237 = vmatmul.mubr.bf16.gmra.mrb[4].mxu0 %v633_v22  ;;  %v2386_v22 = vld [vmem:[%s2894_s3 + $0x20] sm:$0xff]  }
  0xa8   : > { %2240 = vmatprep.mubr.bf16.mxu0 %v634_v25  ;;  %2256 = vmatprep.subr.bf16.mxu1 %v2386_v22 }
  0xa9   : > { %2257 = vmatpush3.bf16.msra.mxu1 %v2386_v22 }
  0xaa   : > { %2258 = vmatprep.subr.bf16.mxu1 %v2387_v31 }
  0xad   : > { %2259 = vmatpush3.bf16.msra.mxu1 %v2387_v31 }
  0xae   : > { %2260 = vmatprep.subr.bf16.mxu1 %v2388_v40 }
  0xaf   : > { %2241 = vmatmul.mubr.bf16.gmra.mrb[8].mxu0 %v635_v33  ;;  %v2977_v33 = vld [vmem:[#allocation3 + $0x58] sm:$0xff] }
  0xb0   : > { %2244 = vmatprep.mubr.bf16.mxu0 %v636_v36 }
  0xb1   : > { %2261 = vmatpush3.bf16.msra.mxu1 %v2388_v40  ;;  %v3037_v40 = vld [vmem:[#allocation3 + $0x68] sm:$0xff] }
  0xb7   : > { %2245 = vmatmul.mubr.bf16.gmra.mrb[12].mxu0 %v637_v39  ;;  %v2989_v39 = vld [vmem:[#allocation3 + $0x50] sm:$0xff] }
 0x172   : > { %v2829_v41 = vpop.f32.mrb[0].mxu0 }
 0x173   : > { %884 = vmax.xlane.f32.xlu1 %v2829_v41  ;;  %v2832_v42 = vpop.f32.mrb[1].mxu0 }
 0x174   : > { %880 = vmax.xlane.f32.xlu0 %v2832_v42  ;;  %v2835_v43 = vpop.f32.mrb[2].mxu0 }
 0x175   : > { %v2837_v44 = vpop.f32.mrb[3].mxu0 }
 0x177   : > { %886 = vmax.xlane.f32.xlu1 %v2835_v43 }
 0x178   : > { %882 = vmax.xlane.f32.xlu0 %v2837_v44 }
 0x17a   : > { %v2841_v45 = vpop.f32.mrb[4].mxu0 }
 0x17b   : > { %v2843_v46 = vpop.f32.mrb[5].mxu0 }
 0x17c   : > { %888 = vmax.xlane.f32.xlu0 %v2843_v46  ;;  %v2846_v47 = vpop.f32.mrb[6].mxu0 }
 0x17d   : > { %894 = vmax.xlane.f32.xlu1 %v2846_v47  ;;  %v2849_v48 = vpop.f32.mrb[7].mxu0 }
 0x180   : > { %892 = vmax.xlane.f32.xlu0 %v2841_v45 }
 0x181   : > { %890 = vmax.xlane.f32.xlu1 %v2849_v48 }
 0x182   : > { %v2853_v49 = vpop.f32.mrb[8].mxu0 }
 0x183   : > { %v2855_v51 = vpop.f32.mrb[9].mxu0 }
 0x184   : > { %v2857_v52 = vpop.f32.mrb[10].mxu0  ;;  %896 = vmax.xlane.f32.xlu0 %v2855_v51 }
 0x185   : > { %902 = vmax.xlane.f32.xlu1 %v2857_v52  ;;  %v2861_v53 = vpop.f32.mrb[11].mxu0 }
 0x188   : > { %900 = vmax.xlane.f32.xlu0 %v2853_v49 }
 0x189   : > { %898 = vmax.xlane.f32.xlu1 %v2861_v53 }
 0x18a   : > { %v2865_v54 = vpop.f32.mrb[12].mxu0 }
 0x18b   : > { %v2883_v56 = vpop.f32.mrb[13].mxu0 }
 0x18c   : > { %v2885_v57 = vpop.f32.mrb[14].mxu0  ;;  %904 = vmax.xlane.f32.xlu0 %v2883_v56 }
 0x18d   : > { %910 = vmax.xlane.f32.xlu1 %v2885_v57  ;;  %v2889_v58 = vpop.f32.mrb[15].mxu0 }
 0x190   : > { %908 = vmax.xlane.f32.xlu0 %v2865_v54 }
 0x191   : > { %906 = vmax.xlane.f32.xlu1 %v2889_v58 }
 0x200   : > { %v885_v63 = vpop.xlane.xlu1 %884 }
 0x201   : > { %v2903_v0 = vmax.f32 %v2898_v61, %v885_v63  ;;  %v881_v1 = vpop.xlane.xlu0 %880 }
 0x202   : > { %v2906_v2 = vmax.f32 %v2900_v62, %v881_v1 }
 0x203   : > { %v930_v4 = vsub.f32 %v2898_v61, %v2903_v0  ;;  %1516 = vst.msk [vmem:[#allocation3 + $0x10] sm:$0xff] %vm646_vm0, %v2903_v0  ;;  %988 = vperm.xlu1 %2373, %v2903_v0  }
 0x204   : > { %1514 = vst.msk [vmem:[#allocation3] sm:$0xff] %vm646_vm0, %v2906_v2  ;;  %v887_v8 = vpop.xlane.xlu1 %886  ;;  %978 = vperm.xlu0 %2372, %v2906_v2  }
 0x205   : > { %v2924_v9 = vmax.f32 %v2908_v3, %v887_v8  ;;  %v883_v10 = vpop.xlane.xlu0 %882  ;;  %v3009_v8 = vld [vmem:[#allocation3 + $0x60] sm:$0xff] }
 0x206   : > { %v2927_v11 = vmax.f32 %v2915_v5, %v883_v10  ;;  %v2389_v10 = vld [vmem:[%s2894_s3 + $0x38] sm:$0xff]  }
 0x207   : > { %1517 = vst.msk [vmem:[#allocation3 + $0x18] sm:$0xff] %vm646_vm0, %v2924_v9  ;;  %993 = vperm.xlu1 %2373, %v2924_v9   ;;  %2262 = vmatprep.subr.bf16.mxu1 %v2389_v10 }
 0x208   : > { %v929_v15 = vsub.f32 %v2915_v5, %v2927_v11  ;;  %1515 = vst.msk [vmem:[#allocation3 + $0x8] sm:$0xff] %vm646_vm0, %v2927_v11  ;;  %2263 = vmatpush3.bf16.msra.mxu1 %v2389_v10 }
 0x209   : > { %v889_v17 = vpop.xlane.xlu0 %888 }
 0x20a   : > { %v2944_v18 = vmax.f32 %v2934_v13, %v889_v17  ;;  %v895_v19 = vpop.xlane.xlu1 %894  ;;  %v3017_v17 = vld [vmem:[#allocation3 + $0x78] sm:$0xff] }
 0x20b   : > { %v2947_v20 = vmax.f32 %v2941_v16, %v895_v19  ;;  %983 = vperm.xlu1 %2373, %v2927_v11  }
 0x20c   : > { %1518 = vst.msk [vmem:[#allocation3 + $0x20] sm:$0xff] %vm646_vm0, %v2944_v18 }
 0x20d   : > { %1521 = vst.msk [vmem:[#allocation3 + $0x38] sm:$0xff] %vm646_vm0, %v2947_v20  ;;  %v893_v26 = vpop.xlane.xlu0 %892 }
 0x20e   : > { %v2964_v27 = vmax.f32 %v2950_v21, %v893_v26  ;;  %v891_v28 = vpop.xlane.xlu1 %890 }
 0x20f   : > { %v2967_v29 = vmax.f32 %v2957_v24, %v891_v28 }
 0x210   : > { %1520 = vst.msk [vmem:[#allocation3 + $0x30] sm:$0xff] %vm646_vm0, %v2964_v27  ;;  %1008 = vperm.xlu1 %2373, %v2964_v27   ;;  %v3310_v61 = vsub.f32 %v2950_v21, %v2964_v27 }
 0x211   : > { %1519 = vst.msk [vmem:[#allocation3 + $0x28] sm:$0xff] %vm646_vm0, %v2967_v29  ;;  %v897_v35 = vpop.xlane.xlu0 %896 }
 0x212   : > { %v903_v36 = vpop.xlane.xlu1 %902  ;;  %v2984_v37 = vmax.f32 %v2969_v30, %v897_v35  ;;  %v3030_v35 = vld [vmem:[#allocation3 + $0x70] sm:$0xff]  ;;  %v956_v0 = vmul.f32 1.442695, %v3310_v61 }
 0x213   : > { %v2987_v38 = vmax.f32 %v2977_v33, %v903_v36 }
 0x214   : > { %1522 = vst.msk [vmem:[#allocation3 + $0x40] sm:$0xff] %vm646_vm0, %v2984_v37  ;;  %998 = vperm.xlu1 %2373, %v2944_v18   ;;  %v3312_v11 = vsub.f32 %v2969_v30, %v2984_v37 }
 0x215   : > { %1525 = vst.msk [vmem:[#allocation3 + $0x58] sm:$0xff] %vm646_vm0, %v2987_v38  ;;  %v901_v60 = vpop.xlane.xlu0 %900 }
 0x216   : > { %v899_v63 = vpop.xlane.xlu1 %898  ;;  %v3004_v1 = vmax.f32 %v2989_v39, %v901_v60 }
 0x217   : > { %v3007_v6 = vmax.f32 %v2997_v55, %v899_v63 }
 0x218   : > { %1524 = vst.msk [vmem:[#allocation3 + $0x50] sm:$0xff] %vm646_vm0, %v3004_v1  ;;  %1003 = vperm.xlu1 %2373, %v2967_v29   ;;  %v3314_v21 = vsub.f32 %v2989_v39, %v3004_v1  ;;  %v3317_v39 = vsub.f32 %v2977_v33, %v2987_v38 }
 0x219   : > { %1523 = vst.msk [vmem:[#allocation3 + $0x48] sm:$0xff] %vm646_vm0, %v3007_v6  ;;  %1023 = vperm.xlu0 %2372, %v3007_v6   ;;  %v905_v22 = vpop.xlane.xlu0 %904  ;;  %v3315_v27 = vsub.f32 %v2997_v55, %v3007_v6 }
 0x21a   : > { %v911_v26 = vpop.xlane.xlu1 %910  ;;  %v3025_v28 = vmax.f32 %v3009_v8, %v905_v22 }
 0x21b   : > { %v3028_v31 = vmax.f32 %v3017_v17, %v911_v26 }
 0x21c   : > { %1526 = vst.msk [vmem:[#allocation3 + $0x60] sm:$0xff] %vm646_vm0, %v3025_v28  ;;  %1013 = vperm.xlu1 %2373, %v2947_v20  }
 0x21d   : > { %1529 = vst.msk [vmem:[#allocation3 + $0x78] sm:$0xff] %vm646_vm0, %v3028_v31  ;;  %1033 = vperm.xlu0 %2372, %v2987_v38   ;;  %v909_v63 = vpop.xlane.xlu0 %908  ;;  %v3320_v38 = vsub.f32 %v3017_v17, %v3028_v31 }
 0x21e   : > { %v907_v10 = vpop.xlane.xlu1 %906  ;;  %v3045_v22 = vmax.f32 %v3030_v35, %v909_v63 }
 0x21f   : > { %v3048_v26 = vmax.f32 %v3037_v40, %v907_v10 }
 0x220   : > { %1528 = vst.msk [vmem:[#allocation3 + $0x70] sm:$0xff] %vm646_vm0, %v3045_v22  ;;  %1018 = vperm.xlu1 %2373, %v2984_v37   ;;  %v3318_v55 = vsub.f32 %v3030_v35, %v3045_v22  ;;  %v974_v35 = vmul.f32 1.442695, %v3320_v38 }
 0x221   : > { %1527 = vst.msk [vmem:[#allocation3 + $0x68] sm:$0xff] %vm646_vm0, %v3048_v26  ;;  %1043 = vperm.xlu0 %2372, %v3048_v26  }
 0x222   : > { %v972_v6 = vmul.f32 1.442695, %v3318_v55  ;;  %v1112_v55 = vld [vmem:[#allocation4 + $0x40] sm:$0xff] }
 0x224   : > { %1028 = vperm.xlu1 %2373, %v3004_v1   ;;  %v966_v1 = vmul.f32 1.442695, %v3317_v39 }
 0x225   : > { %1053 = vperm.xlu0 %2372, %v3028_v31  }
 0x228   : > { %1038 = vperm.xlu1 %2373, %v3025_v28  }
 0x22c   : > { %1048 = vperm.xlu1 %2373, %v3045_v22  }
 0x282   : > { %v989_v63 = vpop.permute.xlu1 %988 }
 0x283   : > { %v1058_v10 = vsub.f32 %v2829_v41, %v989_v63  ;;  %v979_v59 = vpop.permute.xlu0 %978 }
 0x284   : > { %v1056_v36 = vsub.f32 %v2832_v42, %v979_v59 }
 0x285   : > { %v1076_v60 = vmul.f32 1.442695, %v1058_v10 }
 0x286   : > { %v1072_v19 = vmul.f32 1.442695, %v1056_v36  ;;  %v994_v14 = vpop.permute.xlu1 %993 }
 0x287   : > { %2390 = vpow2.f32 %v1076_v60  ;;  %v1059_v25 = vsub.f32 %v2835_v43, %v994_v14 }
 0x288   : > { %2392 = vpow2.f32 %v1072_v19 }
 0x289   : > { %v1078_v50 = vmul.f32 1.442695, %v1059_v25 }
 0x28a   : > { %v984_v34 = vpop.permute.xlu1 %983 }
 0x28b   : > { %2394 = vpow2.f32 %v1078_v50  ;;  %v1057_v32 = vsub.f32 %v2837_v44, %v984_v34 }
 0x28d   : > { %v1074_v12 = vmul.f32 1.442695, %v1057_v32 }
 0x28f   : > { %2396 = vpow2.f32 %v1074_v12  ;;  %v1009_v23 = vpop.permute.xlu1 %1008 }
 0x290   : > { %v1062_v41 = vsub.f32 %v2841_v45, %v1009_v23 }
 0x291   : > { %v2391_v63 = vpop.eup %2390 }
 0x292   : > { %v2393_v7 = vpop.eup %2392  ;;  %v1084_v42 = vmul.f32 1.442695, %v1062_v41  ;;  %1140 = vadd.xlane.f32.xlu0 %v2391_v63 }
 0x293   : > { %1136 = vadd.xlane.f32.xlu1 %v2393_v7  ;;  %v999_v59 = vpop.permute.xlu1 %998 }
 0x294   : > { %2398 = vpow2.f32 %v1084_v42  ;;  %v1060_v43 = vsub.f32 %v2843_v46, %v999_v59 }
 0x295   : > { %v2395_v14 = vpop.eup %2394 }
 0x296   : > { %v1080_v25 = vmul.f32 1.442695, %v1060_v43  ;;  %v1314_v19 = vpack.c.bf16 %v2395_v14, %v2391_v63 }
 0x297   : > { %1142 = vadd.xlane.f32.xlu1 %v2395_v14  ;;  %v1004_v50 = vpop.permute.xlu1 %1003 }
 0x298   : > { %2400 = vpow2.f32 %v1080_v25  ;;  %v1061_v44 = vsub.f32 %v2849_v48, %v1004_v50  ;;  %v1024_v12 = vpop.permute.xlu0 %1023 }
 0x299   : > { %v2397_v32 = vpop.eup %2396  ;;  %v1065_v34 = vsub.f32 %v2861_v53, %v1024_v12 }
 0x29a   : > { %v1082_v45 = vmul.f32 1.442695, %v1061_v44  ;;  %1138 = vadd.xlane.f32.xlu0 %v2397_v32  ;;  %v1313_v23 = vpack.c.bf16 %v2397_v32, %v2393_v7 }
 0x29b   : > { %v1014_v36 = vpop.permute.xlu1 %1013  ;;  %v1090_v63 = vmul.f32 1.442695, %v1065_v34 }
 0x29c   : > { %2402 = vpow2.f32 %v1082_v45  ;;  %v1063_v60 = vsub.f32 %v2846_v47, %v1014_v36  ;;  %v1034_v46 = vpop.permute.xlu0 %1033  ;;  %2264 = vmatprep.mubr.bf16.mxu1 %v1313_v23 }
 0x29d   : > { %2265 = vmatmul.mubr.bf16.vlgmr.msra.gmra.mrb[0].mxu1 %v1314_v19  ;;  %v1067_v42 = vsub.f32 %v2857_v52, %v1034_v46 }
 0x29e   : > { %v2399_v10 = vpop.eup %2398  ;;  %v1086_v41 = vmul.f32 1.442695, %v1063_v60 }
 0x29f   : > { %1148 = vadd.xlane.f32.xlu0 %v2399_v10  ;;  %v1019_v48 = vpop.permute.xlu1 %1018  ;;  %v1094_v14 = vmul.f32 1.442695, %v1067_v42 }
 0x2a0   : > { %2404 = vpow2.f32 %v1086_v41  ;;  %v1064_v59 = vsub.f32 %v2855_v51, %v1019_v48  ;;  %v1044_v7 = vpop.permute.xlu0 %1043 }
 0x2a1   : > { %2406 = vpow2.f32 %v1090_v63  ;;  %v1069_v47 = vsub.f32 %v2889_v58, %v1044_v7 }
 0x2a2   : > { %v2401_v43 = vpop.eup %2400  ;;  %v1088_v53 = vmul.f32 1.442695, %v1064_v59 }
 0x2a3   : > { %1144 = vadd.xlane.f32.xlu0 %v2401_v43  ;;  %v1029_v25 = vpop.permute.xlu1 %1028  ;;  %v1098_v12 = vmul.f32 1.442695, %v1069_v47  ;;  %v946_v47 = vmul.f32 1.442695, %v929_v15 }
 0x2a4   : > { %2408 = vpow2.f32 %v1088_v53  ;;  %v1066_v19 = vsub.f32 %v2853_v49, %v1029_v25  ;;  %v1054_v50 = vpop.permute.xlu0 %1053  ;;  %v948_v25 = vmul.f32 1.442695, %v930_v4 }
 0x2a5   : > { %2410 = vpow2.f32 %v1094_v14  ;;  %v1071_v32 = vsub.f32 %v2885_v57, %v1054_v50 }
 0x2a6   : > { %v2403_v44 = vpop.eup %2402  ;;  %v1092_v52 = vmul.f32 1.442695, %v1066_v19  ;;  %v3307_v19 = vsub.f32 %v2900_v62, %v2906_v2  ;;  %v3311_v62 = vsub.f32 %v2957_v24, %v2967_v29  ;;  %v964_v24 = vmul.f32 1.442695, %v3314_v21 }
 0x2a7   : > { %v1039_v51 = vpop.permute.xlu1 %1038  ;;  %v1315_v45 = vpack.c.bf16 %v2403_v44, %v2401_v43  ;;  %v1102_v36 = vmul.f32 1.442695, %v1071_v32  ;;  %v962_v29 = vmul.f32 1.442695, %v3315_v27 }
 0x2a8   : > { %2412 = vpow2.f32 %v1092_v52  ;;  %v1068_v23 = vsub.f32 %v2883_v56, %v1039_v51  ;;  %v944_v50 = vmul.f32 1.442695, %v3307_v19  ;;  %v954_v2 = vmul.f32 1.442695, %v3311_v62 }
 0x2a9   : > { %2268 = vmatprep.mubr.bf16.mxu1 %v1315_v45  ;;  %2414 = vpow2.f32 %v1098_v12  ;;  %v3309_v12 = vsub.f32 %v2908_v3, %v2924_v9  ;;  %v960_v3 = vmul.f32 1.442695, %v3312_v11  ;;  %v3313_v9 = vsub.f32 %v2941_v16, %v2947_v20 }
 0x2aa   : > { %v2405_v34 = vpop.eup %2404  ;;  %v1096_v58 = vmul.f32 1.442695, %v1068_v23  ;;  %v3316_v16 = vsub.f32 %v3009_v8, %v3025_v28  ;;  %v3319_v8 = vsub.f32 %v3037_v40, %v3048_v26 }
 0x2ab   : > { %1150 = vadd.xlane.f32.xlu1 %v2405_v34  ;;  %v1049_v60 = vpop.permute.xlu1 %1048  ;;  %v1316_v49 = vpack.c.bf16 %v2405_v34, %v2399_v10  ;;  %v2407_v41 = vpop.eup %2406  ;;  %v950_v5 = vmul.f32 1.442695, %v3309_v12 }
 0x2ac   : > { %2416 = vpow2.f32 %v1096_v58  ;;  %v1070_v46 = vsub.f32 %v2865_v54, %v1049_v60  ;;  %v968_v20 = vmul.f32 1.442695, %v3316_v16  ;;  %v970_v28 = vmul.f32 1.442695, %v3319_v8  ;;  %v1106_v58 = vld [vmem:[#allocation4 + $0x10] sm:$0xff] }
 0x2ad   : > { %2269 = vmatmul.mubr.bf16.gmra.mrb[4].mxu1 %v1316_v49  ;;  %2418 = vpow2.f32 %v1102_v36  ;;  %v1104_v36 = vld [vmem:[#allocation4] sm:$0xff] }
 0x2ae   : > { %v2409_v63 = vpop.eup %2408  ;;  %v1100_v57 = vmul.f32 1.442695, %v1070_v46 }
 0x2af   : > { %1146 = vadd.xlane.f32.xlu1 %v2403_v44  ;;  %v1317_v42 = vpack.c.bf16 %v2407_v41, %v2409_v63  ;;  %v2411_v56 = vpop.eup %2410  ;;  %v3308_v44 = vsub.f32 %v2934_v13, %v2944_v18  ;;  %v958_v13 = vmul.f32 1.442695, %v3313_v9 }
 0x2b0   : > { %2420 = vpow2.f32 %v1100_v57  ;;  %v1107_v57 = vld [vmem:[#allocation4 + $0x18] sm:$0xff] }
 0x2b1   : > { %2272 = vmatprep.mubr.bf16.mxu1 %v1317_v42  ;;  %2422 = vpow2.f32 %v946_v47  ;;  %v952_v52 = vmul.f32 1.442695, %v3308_v44 }
 0x2b2   : > { %v2413_v48 = vpop.eup %2412  ;;  %2424 = vpow2.f32 %v948_v25 }
 0x2b3   : > { %1158 = vadd.xlane.f32.xlu1 %v2411_v56  ;;  %1156 = vadd.xlane.f32.xlu0 %v2413_v48  ;;  %v1318_v59 = vpack.c.bf16 %v2411_v56, %v2413_v48  ;;  %v2415_v7 = vpop.eup %2414  ;;  %2426 = vpow2.f32 %v944_v50  ;;  %v1105_v48 = vld [vmem:[#allocation4 + $0x8] sm:$0xff]  ;;  %v1108_v50 = vld [vmem:[#allocation4 + $0x20] sm:$0xff] }
 0x2b4   : > { %2428 = vpow2.f32 %v952_v52 }
 0x2b5   : > { %2273 = vmatmul.mubr.bf16.gmra.mrb[8].mxu1 %v1318_v59  ;;  %2430 = vpow2.f32 %v950_v5 }
 0x2b6   : > { %v2417_v10 = vpop.eup %2416  ;;  %2432 = vpow2.f32 %v956_v0 }
 0x2b7   : > { %1154 = vadd.xlane.f32.xlu1 %v2407_v41  ;;  %1152 = vadd.xlane.f32.xlu0 %v2409_v63  ;;  %v1319_v54 = vpack.c.bf16 %v2415_v7, %v2417_v10  ;;  %v2419_v43 = vpop.eup %2418  ;;  %2434 = vpow2.f32 %v954_v2  ;;  %v1111_v2 = vld [vmem:[#allocation4 + $0x38] sm:$0xff] }
 0x2b8   : > { %2436 = vpow2.f32 %v960_v3 }
 0x2b9   : > { %2276 = vmatprep.mubr.bf16.mxu1 %v1319_v54  ;;  %2438 = vpow2.f32 %v958_v13  ;;  %v1109_v13 = vld [vmem:[#allocation4 + $0x28] sm:$0xff] }
 0x2ba   : > { %v2421_v53 = vpop.eup %2420  ;;  %2440 = vpow2.f32 %v964_v24 }
 0x2bb   : > { %1166 = vadd.xlane.f32.xlu1 %v2419_v43  ;;  %1160 = vadd.xlane.f32.xlu0 %v2417_v10  ;;  %v1320_v14 = vpack.c.bf16 %v2419_v43, %v2421_v53  ;;  %v3101_v4 = vpop.eup %2422  ;;  %2442 = vpow2.f32 %v962_v29 }
 0x2bc   : > { %v2425_v15 = vpop.eup %2424  ;;  %2444 = vpow2.f32 %v968_v20  ;;  %v1121_v10 = vmul.f32 %v3101_v4, %v1105_v48 }
 0x2bd   : > { %2277 = vmatmul.mubr.bf16.gmra.mrb[12].mxu1 %v1320_v14  ;;  %v2427_v18 = vpop.eup %2426  ;;  %2446 = vpow2.f32 %v966_v1  ;;  %v1122_v60 = vmul.f32 %v2425_v15, %v1106_v58  ;;  %v1116_v58 = vld [vmem:[#allocation4 + $0x60] sm:$0xff] }
 0x2be   : > { %v3116_v30 = vpop.eup %2428  ;;  %2448 = vpow2.f32 %v972_v6  ;;  %v1120_v46 = vmul.f32 %v2427_v18, %v1104_v36  ;;  %v1113_v6 = vld [vmem:[#allocation4 + $0x48] sm:$0xff]  ;;  %v1119_v36 = vld [vmem:[#allocation4 + $0x78] sm:$0xff] }
 0x2bf   : > { %1162 = vadd.xlane.f32.xlu1 %v2415_v7  ;;  %1164 = vadd.xlane.f32.xlu0 %v2421_v53  ;;  %v2431_v37 = vpop.eup %2430  ;;  %2450 = vpow2.f32 %v970_v28  ;;  %v1110_v53 = vld [vmem:[#allocation4 + $0x30] sm:$0xff]  ;;  %v1124_v12 = vmul.f32 %v3116_v30, %v1108_v50 }
 0x2c0   : > { %v2433_v32 = vpop.eup %2432  ;;  %2452 = vpow2.f32 %v974_v35  ;;  %v1123_v56 = vmul.f32 %v2431_v37, %v1107_v57 }
 0x2c1   : > { %v3125_v51 = vpop.eup %2434  ;;  %v1126_v47 = vmul.f32 %v2433_v32, %v1110_v53 }
 0x2c2   : > { %v3134_v45 = vpop.eup %2436  ;;  %v1125_v24 = vmul.f32 %v3125_v51, %v1109_v13 }
 0x2c3   : > { %v3136_v33 = vpop.eup %2438  ;;  %v1128_v38 = vmul.f32 %v3134_v45, %v1112_v55 }
 0x2c4   : > { %v3143_v22 = vpop.eup %2440  ;;  %v1127_v11 = vmul.f32 %v3136_v33, %v1111_v2 }
 0x2c5   : > { %v3145_v23 = vpop.eup %2442 }
 0x2c6   : > { %v3149_v40 = vpop.eup %2444  ;;  %v1129_v35 = vmul.f32 %v3145_v23, %v1113_v6 }
 0x2c7   : > { %v3151_v26 = vpop.eup %2446 }
 0x2c8   : > { %v3155_v17 = vpop.eup %2448 }
 0x2c9   : > { %v3157_v31 = vpop.eup %2450 }
 0x2ca   : > { %v3161_v34 = vpop.eup %2452 }
 0x2d0   : > { %1224 = vperm.xlu1 %2373, %v3101_v4  }
 0x2d4   : > { %1229 = vperm.xlu1 %2373, %v2425_v15  }
 0x2d5   : > { %1219 = vperm.xlu0 %2372, %v2427_v18  }
 0x2d8   : > { %1239 = vperm.xlu1 %2373, %v3116_v30   ;;  %v1114_v30 = vld [vmem:[#allocation4 + $0x50] sm:$0xff] }
 0x2d9   : > { %1234 = vperm.xlu0 %2372, %v2431_v37   ;;  %v1115_v37 = vld [vmem:[#allocation4 + $0x58] sm:$0xff]  ;;  %v1130_v20 = vmul.f32 %v3143_v22, %v1114_v30 }
 0x2da   : > { %v1131_v39 = vmul.f32 %v3151_v26, %v1115_v37 }
 0x2dc   : > { %1249 = vperm.xlu1 %2373, %v2433_v32  }
 0x2dd   : > { %1244 = vperm.xlu0 %2372, %v3125_v51  }
 0x2e0   : > { %1259 = vperm.xlu1 %2373, %v3134_v45   ;;  %v1135_v45 = vmul.f32 %v3161_v34, %v1119_v36 }
 0x2e1   : > { %1254 = vperm.xlu0 %2372, %v3136_v33  }
 0x2e4   : > { %1269 = vperm.xlu1 %2373, %v3143_v22  }
 0x2e5   : > { %1264 = vperm.xlu0 %2372, %v3145_v23  }
 0x2e8   : > { %1279 = vperm.xlu1 %2373, %v3149_v40  }
 0x2e9   : > { %1274 = vperm.xlu0 %2372, %v3151_v26  }
 0x2ec   : > { %1289 = vperm.xlu1 %2373, %v3155_v17  }
 0x2ed   : > { %1284 = vperm.xlu0 %2372, %v3157_v31  }
 0x2f1   : > { %1294 = vperm.xlu0 %2372, %v3161_v34  }
 0x31f   : > { %v1141_v49 = vpop.xlane.xlu0 %1140 }
 0x320   : > { %v1170_v41 = vadd.f32 %v1141_v49, %v1122_v60  ;;  %v1137_v63 = vpop.xlane.xlu1 %1136 }
 0x321   : > { %v1168_v42 = vadd.f32 %v1137_v63, %v1120_v46  ;;  %v1132_v63 = vmul.f32 %v3149_v40, %v1116_v58 }
 0x322   : > { %1187 = vst.msk [vmem:[#allocation4 + $0x10] sm:$0xff] %vm646_vm0, %v1170_v41 }
 0x323   : > { %1185 = vst.msk [vmem:[#allocation4] sm:$0xff] %vm646_vm0, %v1168_v42  ;;  %v1118_v42 = vld [vmem:[#allocation4 + $0x70] sm:$0xff] }
 0x324   : > { %v1143_v59 = vpop.xlane.xlu1 %1142 }
 0x325   : > { %v1171_v7 = vadd.f32 %v1143_v59, %v1123_v56  ;;  %v1117_v56 = vld [vmem:[#allocation4 + $0x68] sm:$0xff] }
 0x327   : > { %1188 = vst.msk [vmem:[#allocation4 + $0x18] sm:$0xff] %vm646_vm0, %v1171_v7  ;;  %v1139_v54 = vpop.xlane.xlu0 %1138 }
 0x328   : > { %v1169_v43 = vadd.f32 %v1139_v54, %v1121_v10  ;;  %v1134_v54 = vmul.f32 %v3155_v17, %v1118_v42 }
 0x329   : > { %v1535_v14 = vld [vmem:[#allocation4 + $0x10] sm:$0xff] }
 0x32a   : > { %1186 = vst.msk [vmem:[#allocation4 + $0x8] sm:$0xff] %vm646_vm0, %v1169_v43  ;;  %2454 = vrcp.f32 %v1535_v14  ;;  %v1533_v25 = vld [vmem:[#allocation4] sm:$0xff]  ;;  %v1133_v43 = vmul.f32 %v3157_v31, %v1117_v56 }
 0x32b   : > { %2456 = vrcp.f32 %v1533_v25 }
 0x32c   : > { %v1149_v19 = vpop.xlane.xlu0 %1148 }
 0x32d   : > { %v1174_v44 = vadd.f32 %v1149_v19, %v1126_v47 }
 0x32e   : > { %v1536_v52 = vld [vmem:[#allocation4 + $0x18] sm:$0xff] }
 0x32f   : > { %1191 = vst.msk [vmem:[#allocation4 + $0x30] sm:$0xff] %vm646_vm0, %v1174_v44  ;;  %2458 = vrcp.f32 %v1536_v52 }
 0x330   : > { %v1145_v5 = vpop.xlane.xlu0 %1144 }
 0x331   : > { %v1172_v61 = vadd.f32 %v1145_v5, %v1124_v12  ;;  %v1534_v0 = vld [vmem:[#allocation4 + $0x8] sm:$0xff] }
 0x332   : > { %2460 = vrcp.f32 %v1534_v0 }
 0x333   : > { %1189 = vst.msk [vmem:[#allocation4 + $0x20] sm:$0xff] %vm646_vm0, %v1172_v61 }
 0x334   : > { %v2455_v62 = vpop.eup %2454 }
 0x335   : > { %1593 = vperm.xlu1 %2373, %v2455_v62   ;;  %v2457_v3 = vpop.eup %2456 }
 0x336   : > { %v1539_v4 = vld [vmem:[#allocation4 + $0x30] sm:$0xff] }
 0x337   : > { %2462 = vrcp.f32 %v1539_v4 }
 0x338   : > { %v1151_v9 = vpop.xlane.xlu1 %1150 }
 0x339   : > { %v2459_v15 = vpop.eup %2458  ;;  %v1175_v18 = vadd.f32 %v1151_v9, %v1127_v11  ;;  %1583 = vperm.xlu1 %2373, %v2457_v3  }
 0x33a   : > { %1598 = vperm.xlu0 %2372, %v2459_v15   ;;  %v1537_v21 = vld [vmem:[#allocation4 + $0x20] sm:$0xff] }
 0x33b   : > { %1192 = vst.msk [vmem:[#allocation4 + $0x38] sm:$0xff] %vm646_vm0, %v1175_v18  ;;  %2464 = vrcp.f32 %v1537_v21 }
 0x33c   : > { %v2461_v27 = vpop.eup %2460  ;;  %v1147_v29 = vpop.xlane.xlu1 %1146 }
 0x33d   : > { %v1173_v16 = vadd.f32 %v1147_v29, %v1125_v24 }
 0x33e   : > { %1588 = vperm.xlu0 %2372, %v2461_v27  }
 0x33f   : > { %1190 = vst.msk [vmem:[#allocation4 + $0x28] sm:$0xff] %vm646_vm0, %v1173_v16 }
 0x340   : > { %v1157_v1 = vpop.xlane.xlu0 %1156  ;;  %v1159_v32 = vpop.xlane.xlu1 %1158 }
 0x341   : > { %v2463_v8 = vpop.eup %2462  ;;  %v1178_v28 = vadd.f32 %v1157_v1, %v1130_v20  ;;  %v1179_v51 = vadd.f32 %v1159_v32, %v1131_v39 }
 0x342   : > { %1613 = vperm.xlu1 %2373, %v2463_v8   ;;  %v1540_v33 = vld [vmem:[#allocation4 + $0x38] sm:$0xff] }
 0x343   : > { %1195 = vst.msk [vmem:[#allocation4 + $0x50] sm:$0xff] %vm646_vm0, %v1178_v28  ;;  %1196 = vst.msk [vmem:[#allocation4 + $0x58] sm:$0xff] %vm646_vm0, %v1179_v51  ;;  %2466 = vrcp.f32 %v1540_v33 }
 0x344   : > { %v1153_v22 = vpop.xlane.xlu0 %1152  ;;  %v1155_v26 = vpop.xlane.xlu1 %1154 }
 0x345   : > { %v2465_v60 = vpop.eup %2464  ;;  %v1176_v49 = vadd.f32 %v1153_v22, %v1128_v38  ;;  %v1177_v46 = vadd.f32 %v1155_v26, %v1129_v35 }
 0x346   : > { %1603 = vperm.xlu1 %2373, %v2465_v60   ;;  %v1538_v41 = vld [vmem:[#allocation4 + $0x28] sm:$0xff] }
 0x347   : > { %1193 = vst.msk [vmem:[#allocation4 + $0x40] sm:$0xff] %vm646_vm0, %v1176_v49  ;;  %1194 = vst.msk [vmem:[#allocation4 + $0x48] sm:$0xff] %vm646_vm0, %v1177_v46  ;;  %2468 = vrcp.f32 %v1538_v41 }
 0x348   : > { %v1161_v23 = vpop.xlane.xlu0 %1160  ;;  %v1167_v57 = vpop.xlane.xlu1 %1166 }
 0x349   : > { %v1180_v48 = vadd.f32 %v1161_v23, %v1132_v63  ;;  %v1183_v59 = vadd.f32 %v1167_v57, %v1135_v45 }
 0x34a   : > { %v1543_v7 = vld [vmem:[#allocation4 + $0x50] sm:$0xff]  ;;  %v1544_v10 = vld [vmem:[#allocation4 + $0x58] sm:$0xff] }
 0x34b   : > { %1197 = vst.msk [vmem:[#allocation4 + $0x60] sm:$0xff] %vm646_vm0, %v1180_v48  ;;  %1200 = vst.msk [vmem:[#allocation4 + $0x78] sm:$0xff] %vm646_vm0, %v1183_v59  ;;  %2470 = vrcp.f32 %v1543_v7 }
 0x34c   : > { %v1165_v40 = vpop.xlane.xlu0 %1164  ;;  %v1163_v34 = vpop.xlane.xlu1 %1162  ;;  %2472 = vrcp.f32 %v1544_v10 }
 0x34d   : > { %v2467_v53 = vpop.eup %2466  ;;  %v1182_v14 = vadd.f32 %v1165_v40, %v1134_v54  ;;  %v1181_v47 = vadd.f32 %v1163_v34, %v1133_v43 }
 0x34e   : > { %1618 = vperm.xlu0 %2372, %v2467_v53   ;;  %v1541_v25 = vld [vmem:[#allocation4 + $0x40] sm:$0xff]  ;;  %v1542_v19 = vld [vmem:[#allocation4 + $0x48] sm:$0xff] }
 0x34f   : > { %1199 = vst.msk [vmem:[#allocation4 + $0x70] sm:$0xff] %vm646_vm0, %v1182_v14  ;;  %1198 = vst.msk [vmem:[#allocation4 + $0x68] sm:$0xff] %vm646_vm0, %v1181_v47  ;;  %2474 = vrcp.f32 %v1541_v25 }
 0x350   : > { %2476 = vrcp.f32 %v1542_v19  ;;  %v1225_v29 = vpop.permute.xlu1 %1224 }
 0x351   : > { %v2469_v50 = vpop.eup %2468  ;;  %v1298_v48 = vmul.f32 0.0, %v1225_v29 }
 0x352   : > { %1608 = vperm.xlu0 %2372, %v2469_v50   ;;  %v1545_v17 = vld [vmem:[#allocation4 + $0x60] sm:$0xff]  ;;  %v1548_v61 = vld [vmem:[#allocation4 + $0x78] sm:$0xff] }
 0x353   : > { %2478 = vrcp.f32 %v1545_v17 }
 0x354   : > { %v1220_v20 = vpop.permute.xlu0 %1219  ;;  %v1230_v1 = vpop.permute.xlu1 %1229 }
 0x355   : > { %v2471_v31 = vpop.eup %2470  ;;  %v1299_v45 = vmul.f32 0.0, %v1230_v1  ;;  %v1297_v59 = vmul.f32 0.0, %v1220_v20 }
 0x356   : > { %v2473_v44 = vpop.eup %2472  ;;  %1633 = vperm.xlu1 %2373, %v2471_v31   ;;  %v1547_v52 = vld [vmem:[#allocation4 + $0x70] sm:$0xff]  ;;  %v1546_v12 = vld [vmem:[#allocation4 + $0x68] sm:$0xff] }
 0x357   : > { %1638 = vperm.xlu0 %2372, %v2473_v44   ;;  %2480 = vrcp.f32 %v1547_v52 }
 0x358   : > { %2482 = vrcp.f32 %v1546_v12  ;;  %v1235_v55 = vpop.permute.xlu0 %1234  ;;  %v1240_v28 = vpop.permute.xlu1 %1239 }
 0x359   : > { %v2475_v5 = vpop.eup %2474  ;;  %2484 = vrcp.f32 %v1548_v61  ;;  %v1300_v23 = vmul.f32 0.0, %v1235_v55  ;;  %v1301_v12 = vmul.f32 0.0, %v1240_v28 }
 0x35a   : > { %v2477_v0 = vpop.eup %2476  ;;  %1623 = vperm.xlu1 %2373, %v2475_v5  }
 0x35b   : > { %1628 = vperm.xlu0 %2372, %v2477_v0  }
 0x35c   : > { %v1245_v33 = vpop.permute.xlu0 %1244  ;;  %v1250_v38 = vpop.permute.xlu1 %1249 }
 0x35d   : > { %v2479_v62 = vpop.eup %2478  ;;  %v1303_v50 = vmul.f32 0.0, %v1250_v38  ;;  %v1302_v5 = vmul.f32 0.0, %v1245_v33 }
 0x35e   : > { %1643 = vperm.xlu1 %2373, %v2479_v62  }
 0x360   : > { %v1255_v35 = vpop.permute.xlu0 %1254  ;;  %v1260_v22 = vpop.permute.xlu1 %1259 }
 0x361   : > { %v2481_v2 = vpop.eup %2480  ;;  %v1304_v17 = vmul.f32 0.0, %v1255_v35  ;;  %v1305_v55 = vmul.f32 0.0, %v1260_v22 }
 0x362   : > { %v2483_v4 = vpop.eup %2482  ;;  %1653 = vperm.xlu1 %2373, %v2481_v2  }
 0x363   : > { %1648 = vperm.xlu0 %2372, %v2483_v4   ;;  %v2485_v11 = vpop.eup %2484 }
 0x364   : > { %v1265_v26 = vpop.permute.xlu0 %1264  ;;  %v1270_v58 = vpop.permute.xlu1 %1269 }
 0x367   : > { %1658 = vperm.xlu0 %2372, %v2485_v11  }
 0x368   : > { %v1275_v36 = vpop.permute.xlu0 %1274  ;;  %v3208_v60 = vpop.permute.xlu1 %1279 }
 0x369   : > { %v1308_v29 = vmul.f32 0.0, %v1275_v36  ;;  %v1309_v22 = vmul.f32 0.0, %v3208_v60 }
 0x36c   : > { %v3210_v49 = vpop.permute.xlu0 %1284  ;;  %v3212_v46 = vpop.permute.xlu1 %1289 }
 0x370   : > { %v2266_v3 = vpop.f32.mrb[0].mxu1  ;;  %v3214_v41 = vpop.permute.xlu0 %1294 }
 0x371   : > { %v1419_v9 = vpop.f32.mrb[1].mxu1  ;;  %v1484_v57 = vadd.f32 %v2266_v3, %v1299_v45 }
 0x372   : > { %v2267_v13 = vpop.f32.mrb[2].mxu1  ;;  %v1482_v43 = vadd.f32 %v1419_v9, %v1297_v59  ;;  %v1307_v9 = vmul.f32 0.0, %v1270_v58 }
 0x373   : > { %v1422_v15 = vpop.f32.mrb[3].mxu1  ;;  %v1485_v42 = vadd.f32 %v2267_v13, %v1300_v23 }
 0x374   : > { %v1483_v40 = vadd.f32 %v1422_v15, %v1298_v48 }
 0x380   : > { %v2270_v18 = vpop.f32.mrb[4].mxu1 }
 0x381   : > { %v1435_v21 = vpop.f32.mrb[5].mxu1  ;;  %v1488_v31 = vadd.f32 %v2270_v18, %v1303_v50 }
 0x382   : > { %v2271_v24 = vpop.f32.mrb[6].mxu1  ;;  %v1486_v2 = vadd.f32 %v1435_v21, %v1301_v12 }
 0x383   : > { %v1438_v27 = vpop.f32.mrb[7].mxu1  ;;  %v1489_v44 = vadd.f32 %v2271_v24, %v1304_v17 }
 0x384   : > { %v1487_v4 = vadd.f32 %v1438_v27, %v1302_v5  ;;  %v1306_v27 = vmul.f32 0.0, %v1265_v26 }
 0x388   : > { %v3192_v30 = vpop.f32.mrb[8].mxu1 }
 0x389   : > { %v3194_v37 = vpop.f32.mrb[9].mxu1  ;;  %v1492_v20 = vadd.f32 %v3192_v30, %v1307_v9 }
 0x38a   : > { %v3196_v16 = vpop.f32.mrb[10].mxu1  ;;  %v1490_v38 = vadd.f32 %v3194_v37, %v1305_v55 }
 0x38b   : > { %v3198_v39 = vpop.f32.mrb[11].mxu1  ;;  %v1493_v24 = vadd.f32 %v3196_v16, %v1308_v29 }
 0x38c   : > { %v1491_v35 = vadd.f32 %v3198_v39, %v1306_v27 }
 0x390   : > { %v3200_v32 = vpop.f32.mrb[12].mxu1 }
 0x391   : > { %v3202_v6 = vpop.f32.mrb[13].mxu1 }
 0x392   : > { %v3204_v8 = vpop.f32.mrb[14].mxu1  ;;  %v1494_v26 = vadd.f32 %v3202_v6, %v1309_v22 }
 0x393   : > { %v3206_v51 = vpop.f32.mrb[15].mxu1 }
 0x3b4   : > { %v1594_v63 = vpop.permute.xlu1 %1593 }
 0x3b5   : > { %v1663_v7 = vmul.f32 %v1594_v63, %v1484_v57  ;;  %v1310_v57 = vmul.f32 0.0, %v3210_v49 }
 0x3b7   : > { %v1495_v37 = vadd.f32 %v3206_v51, %v1310_v57 }
 0x3b8   : > { %v1584_v54 = vpop.permute.xlu1 %1583 }
 0x3b9   : > { %v1599_v56 = vpop.permute.xlu0 %1598  ;;  %v1661_v14 = vmul.f32 %v1584_v54, %v1482_v43 }
 0x3ba   : > { %v1664_v10 = vmul.f32 %v1599_v56, %v1485_v42  ;;  %v1311_v42 = vmul.f32 0.0, %v3212_v46  ;;  %v1312_v56 = vmul.f32 0.0, %v3214_v41 }
 0x3bc   : > { %v2138_v34 = vpack.c.bf16 %v1664_v10, %v1663_v7  ;;  %v1496_v10 = vadd.f32 %v3200_v32, %v1311_v42  ;;  %v1497_v60 = vadd.f32 %v3204_v8, %v1312_v56 }
 0x3bd   : > { %v1589_v53 = vpop.permute.xlu0 %1588 }
 0x3be   : > { %2177 = vst [vmem:[%s3217_s12 + $0x8] sm:$0xff] %v2138_v34   ;;  %v1662_v47 = vmul.f32 %v1589_v53, %v1483_v40 }
 0x3c0   : > { %v2133_v25 = vpack.c.bf16 %v1662_v47, %v1661_v14 }
 0x3c1   : > { %v1614_v19 = vpop.permute.xlu1 %1613 }
 0x3c2   : > { %2134 = vst [vmem:[%s3217_s12] sm:$0xff] %v2133_v25   ;;  %v1667_v61 = vmul.f32 %v1614_v19, %v1488_v31 }
 0x3c5   : > { %v1604_v62 = vpop.permute.xlu1 %1603  ;;  %v1790_v51 = vld [vmem:[%s3217_s12 + $0x8] sm:$0xf] (%p2710_p13)  ;;  %v1792_v46 = vld [vmem:[%s3217_s12 + $0xc] sm:$0xf] (%p2710_p13) }
 0x3c6   : > { %v1665_v13 = vmul.f32 %v1604_v62, %v1486_v2  ;;  %1791 = vst [vmem:[%s1770_s10 + $0x10] sm:$0xf] (%p2710_p13), %v1790_v51  ;;  %1793 = vst [vmem:[%s1770_s10 + $0x18] sm:$0xf] (%p2710_p13), %v1792_v46 }
 0x3c9   : > { %v1786_v32 = vld [vmem:[%s3217_s12] sm:$0xf] (%p2710_p13)  ;;  %v1788_v8 = vld [vmem:[%s3217_s12 + $0x4] sm:$0xf] (%p2710_p13) }
 0x3ca   : > { %1787 = vst [vmem:[%s1770_s10] sm:$0xf] (%p2710_p13), %v1786_v32  ;;  %1789 = vst [vmem:[%s1770_s10 + $0x8] sm:$0xf] (%p2710_p13), %v1788_v8 }
 0x3cd   : > { %v1619_v52 = vpop.permute.xlu0 %1618 }
 0x3ce   : > { %v1668_v0 = vmul.f32 %v1619_v52, %v1489_v44 }
 0x3d0   : > { %v2148_v11 = vpack.c.bf16 %v1668_v0, %v1667_v61 }
 0x3d1   : > { %v1609_v3 = vpop.permute.xlu0 %1608 }
 0x3d2   : > { %2179 = vst [vmem:[%s3217_s12 + $0x18] sm:$0xff] %v2148_v11   ;;  %v1666_v15 = vmul.f32 %v1609_v3, %v1487_v4 }
 0x3d4   : > { %v2143_v18 = vpack.c.bf16 %v1666_v15, %v1665_v13 }
 0x3d5   : > { %v1634_v1 = vpop.permute.xlu1 %1633 }
 0x3d6   : > { %2178 = vst [vmem:[%s3217_s12 + $0x10] sm:$0xff] %v2143_v18   ;;  %v1639_v28 = vpop.permute.xlu0 %1638  ;;  %v1671_v21 = vmul.f32 %v1634_v1, %v1492_v20 }
 0x3d7   : > { %v1672_v33 = vmul.f32 %v1639_v28, %v1493_v24 }
 0x3d9   : > { %v2158_v58 = vpack.c.bf16 %v1672_v33, %v1671_v21  ;;  %v1624_v36 = vpop.permute.xlu1 %1623  ;;  %v1798_v53 = vld [vmem:[%s3217_s12 + $0x18] sm:$0xf] (%p2710_p13)  ;;  %v1800_v14 = vld [vmem:[%s3217_s12 + $0x1c] sm:$0xf] (%p2710_p13) }
 0x3da   : > { %v1629_v63 = vpop.permute.xlu0 %1628  ;;  %v1669_v30 = vmul.f32 %v1624_v36, %v1490_v38  ;;  %1799 = vst [vmem:[%s1770_s10 + $0x30] sm:$0xf] (%p2710_p13), %v1798_v53  ;;  %1801 = vst [vmem:[%s1770_s10 + $0x38] sm:$0xf] (%p2710_p13), %v1800_v14 }
 0x3db   : > { %2181 = vst [vmem:[%s3217_s12 + $0x28] sm:$0xff] %v2158_v58   ;;  %v1670_v45 = vmul.f32 %v1629_v63, %v1491_v35 }
 0x3dd   : > { %v2153_v23 = vpack.c.bf16 %v1670_v45, %v1669_v30  ;;  %v1644_v16 = vpop.permute.xlu1 %1643  ;;  %v1794_v41 = vld [vmem:[%s3217_s12 + $0x10] sm:$0xf] (%p2710_p13)  ;;  %v1796_v34 = vld [vmem:[%s3217_s12 + $0x14] sm:$0xf] (%p2710_p13) }
 0x3de   : > { %v1673_v48 = vmul.f32 %v1644_v16, %v1494_v26  ;;  %1795 = vst [vmem:[%s1770_s10 + $0x20] sm:$0xf] (%p2710_p13), %v1794_v41  ;;  %1797 = vst [vmem:[%s1770_s10 + $0x28] sm:$0xf] (%p2710_p13), %v1796_v34 }
 0x3df   : > { %2180 = vst [vmem:[%s3217_s12 + $0x20] sm:$0xff] %v2153_v23  }
 0x3e1   : > { %v1654_v7 = vpop.permute.xlu1 %1653 }
 0x3e2   : > { %v1649_v39 = vpop.permute.xlu0 %1648  ;;  %v1675_v43 = vmul.f32 %v1654_v7, %v1496_v10  ;;  %v1806_v19 = vld [vmem:[%s3217_s12 + $0x28] sm:$0xf] (%p2710_p13)  ;;  %v1808_v50 = vld [vmem:[%s3217_s12 + $0x2c] sm:$0xf] (%p2710_p13) }
 0x3e3   : > { %v1674_v59 = vmul.f32 %v1649_v39, %v1495_v37  ;;  %1807 = vst [vmem:[%s1770_s10 + $0x50] sm:$0xf] (%p2710_p13), %v1806_v19  ;;  %1809 = vst [vmem:[%s1770_s10 + $0x58] sm:$0xf] (%p2710_p13), %v1808_v50 }
 0x3e5   : > { %v2163_v54 = vpack.c.bf16 %v1674_v59, %v1673_v48  ;;  %1763 = sbr.rel (!%p2710_p13) target bundleno = 1012 (0x3f4), region = 167 }
 0x3e6   : > { %v1659_v49 = vpop.permute.xlu0 %1658  ;;  %v1802_v47 = vld [vmem:[%s3217_s12 + $0x20] sm:$0xf] (%p2710_p13)  ;;  %v1804_v25 = vld [vmem:[%s3217_s12 + $0x24] sm:$0xf] (%p2710_p13) }
 0x3e7   : > { %2182 = vst [vmem:[%s3217_s12 + $0x30] sm:$0xff] %v2163_v54   ;;  %v1676_v6 = vmul.f32 %v1659_v49, %v1497_v60  ;;  %1803 = vst [vmem:[%s1770_s10 + $0x40] sm:$0xf] (%p2710_p13), %v1802_v47 }
 0x3e8   : > { %1805 = vst [vmem:[%s1770_s10 + $0x48] sm:$0xf] (%p2710_p13), %v1804_v25 }
 0x3e9   : > { %v2168_v40 = vpack.c.bf16 %v1676_v6, %v1675_v43 }
 0x3eb   : > { %2183 = vst [vmem:[%s3217_s12 + $0x38] sm:$0xff] %v2168_v40  }
 0x3ee   : > { %v1810_v17 = vld [vmem:[%s3217_s12 + $0x30] sm:$0xf]  ;;  %v1812_v31 = vld [vmem:[%s3217_s12 + $0x34] sm:$0xf] }
 0x3ef   : > { %1811 = vst [vmem:[%s1770_s10 + $0x60] sm:$0xf] %v1810_v17  ;;  %1813 = vst [vmem:[%s1770_s10 + $0x68] sm:$0xf] %v1812_v31 }
 0x3f2   : > { %v1814_v44 = vld [vmem:[%s3217_s12 + $0x38] sm:$0xf]  ;;  %v1816_v52 = vld [vmem:[%s3217_s12 + $0x3c] sm:$0xf] }
 0x3f3   : > { %1815 = vst [vmem:[%s1770_s10 + $0x70] sm:$0xf] %v1814_v44  ;;  %1817 = vst [vmem:[%s1770_s10 + $0x78] sm:$0xf] %v1816_v52 }
 0x3f4 PF: > { %s13_s22 = sadd.s32 1, %s2572_s22   ;;  %s3322_s30 = sld [smem:[#allocation10_spill]] }
 0x3f5   : > { %p10_p4 = scmp.ge.s32.totalorder %s13_s22, 6   ;;  %s3323_s12 = smov %s2536_s13 }
 0x3f6   : > { %s3324_s13 = smov %s2715_s26  ;;  %s3325_s14 = smov %s2544_s15 }
 0x3f7   : > { %s3326_s15 = smov %s2693_s28  ;;  %s3327_s16 = smov %s2552_s17 }
 0x3f8   : > { %s3328_s17 = smov %s2690_s11  ;;  %s3329_s18 = smov %s2564_s20 }
 0x3f9   : > { %s3330_s19 = smov %s2568_s21  ;;  %s3331_s20 = smov %s3334_s24 }
 0x3fa   : > { %s3332_s21 = smov %s3322_s30  ;;  %12 = sbr.rel (!%p10_p4) target bundleno = 8 (0x8), region = 255 }

</bundles_post_ra>
